<compile_context>
chip_gen: v6e
topology: v6e:2x2x1
jax: 0.10.0
libtpu: 0.0.40
codegen_flags: <defaults>
</compile_context>

<pallas_src>
import jax
import jax.numpy as jnp
from jax.scipy.special import erf as _erf_exact
from jax.experimental import pallas as pl
from jax.experimental.pallas import tpu as pltpu


# ------------------------------- math helpers --------------------------------
_ERF_P = 0.3275911
_ERF_A = (0.254829592, -0.284496736, 1.421413741, -1.453152027, 1.061405429)


def _erf_approx(z):
    # Abramowitz & Stegun 7.1.26, |error| < 1.5e-7 (way below bf16 matmul noise).
    a1, a2, a3, a4, a5 = _ERF_A
    za = jnp.abs(z)
    t = 1.0 / (1.0 + _ERF_P * za)
    poly = ((((a5 * t + a4) * t + a3) * t + a2) * t + a1) * t
    y = 1.0 - poly * jnp.exp(-(za * za))
    return jnp.where(z < 0.0, -y, y)


def _gelu(x):
    # erf-form GELU (matches torch.nn.functional.gelu default)
    return 0.5 * x * (1.0 + _erf_approx(x * 0.7071067811865476))


def _round_up(n, m):
    return ((n + m - 1) // m) * m


def _full_spec(arr):
    nd = arr.ndim
    return pl.BlockSpec(arr.shape, lambda b, _nd=nd: (0,) * _nd)


# ------------------------------ fused kernel ----------------------------------
def _make_fused_kernel(T, depth, d_final, use_mask, has_mid):
    """One kernel: NaN/mask + input Linear + depth residual blocks + final block."""

    def dilated_conv(g, wtap, b, d):
        # 3-tap dilated "same" conv as 3 accumulating MXU matmuls.
        #   g:       (T, Cin) bf16 (already gelu'd)
        #   wtap(k): (Cin, Cout) bf16, taps ordered k=0 -> t-d, k=1 -> t, k=2 -> t+d
        #   b:       (1, Cout) f32
        acc = jnp.dot(g, wtap(1), preferred_element_type=jnp.float32)
        if d < T:  # taps fully inside the zero padding contribute nothing
            C = g.shape[1]
            zpad = jnp.zeros((d, C), g.dtype)
            g_left = jnp.concatenate([zpad, g[: T - d, :]], axis=0)   # rows t-d
            g_right = jnp.concatenate([g[d:, :], zpad], axis=0)       # rows t+d
            acc = acc + jnp.dot(g_left, wtap(0), preferred_element_type=jnp.float32)
            acc = acc + jnp.dot(g_right, wtap(2), preferred_element_type=jnp.float32)
        return acc + b

    def kernel(*refs):
        it = iter(refs)
        x_ref = next(it)
        m_ref = next(it) if use_mask else None
        fc_w_ref = next(it)
        fc_b_ref = next(it)
        if has_mid:
            w1m_ref = next(it)
            b1m_ref = next(it)
            w2m_ref = next(it)
            b2m_ref = next(it)
        w1f_ref = next(it)
        b1f_ref = next(it)
        w2f_ref = next(it)
        b2f_ref = next(it)
        pwf_ref = next(it)
        pbf_ref = next(it)
        o_ref = next(it)

        # ---- NaN zeroing + input Linear + mask zeroing ----------------------
        x = x_ref[0]                                            # (T, Din) f32
        nan_elem = jnp.where(x != x, 1.0, 0.0)                  # isnan via x != x
        valid = jnp.max(nan_elem, axis=-1, keepdims=True) < 0.5  # ~any-NaN per row
        x = jnp.where(valid, x, 0.0)                            # x[~nan_mask] = 0
        h = jnp.dot(x.astype(jnp.bfloat16), fc_w_ref[...],
                    preferred_element_type=jnp.float32) + fc_b_ref[...]
        if use_mask:
            keep = jnp.logical_and(valid, m_ref[0] > 0.5)       # mask &= nan_mask
        else:
            keep = valid                                        # eval: all_true
        h = jnp.where(keep, h, 0.0)                             # (T, H) f32

        # ---- residual dilated-conv blocks, all VMEM-resident -----------------
        if has_mid:
            for i in range(depth):
                d = 2 ** i
                res = h                                         # identity residual
                g1 = _gelu(h).astype(jnp.bfloat16)
                h1 = dilated_conv(g1, lambda k, _i=i: w1m_ref[_i, k], b1m_ref[i], d)
                g2 = _gelu(h1).astype(jnp.bfloat16)
                h = dilated_conv(g2, lambda k, _i=i: w2m_ref[_i, k], b2m_ref[i], d) + res

        # ---- final block: 1x1 projector residual + 2 dilated convs -----------
        res = jnp.dot(h.astype(jnp.bfloat16), pwf_ref[...],
                      preferred_element_type=jnp.float32) + pbf_ref[...]
        g1 = _gelu(h).astype(jnp.bfloat16)
        h1 = dilated_conv(g1, lambda k: w1f_ref[k], b1f_ref[...], d_final)
        g2 = _gelu(h1).astype(jnp.bfloat16)
        out = dilated_conv(g2, lambda k: w2f_ref[k], b2f_ref[...], d_final) + res
        o_ref[0] = out                                          # lane-dense store

    return kernel


def ts_encoder_apply(prep, x, mask_f=None):
    """Fused forward. mask_f: optional (B, T, 1) f32 keep-mask (None = all_true)."""
    B, T, Din = x.shape
    H = prep['fc_w'].shape[1]
    Cp = prep['w2f'].shape[-1]
    depth = prep['depth']
    d_final = 2 ** depth
    has_mid = depth > 0
    use_mask = mask_f is not None

    kernel = _make_fused_kernel(T, depth, d_final, use_mask, has_mid)

    args = [x]
    in_specs = [pl.BlockSpec((1, T, Din), lambda b: (b, 0, 0))]
    if use_mask:
        args.append(mask_f)
        in_specs.append(pl.BlockSpec((1, T, 1), lambda b: (b, 0, 0)))
    weights = [prep['fc_w'], prep['fc_b']]
    if has_mid:
        weights += [prep['w1m'], prep['b1m'], prep['w2m'], prep['b2m']]
    weights += [prep['w1f'], prep['b1f'], prep['w2f'], prep['b2f'],
                prep['pwf'], prep['pbf']]
    for w in weights:
        args.append(w)
        in_specs.append(_full_spec(w))

    flops = 2 * B * T * Din * H
    flops += depth * 2 * (2 * B * T * 3 * H * H)
    flops += 2 * B * T * H * Cp + 2 * B * T * 3 * H * Cp + 2 * B * T * 3 * Cp * Cp
    trans = B * T * (2 * depth * H + H + Cp)          # one exp per gelu element
    bytes_accessed = 4 * x.size + 4 * B * T * Cp + sum(
        int(w.size) * w.dtype.itemsize for w in weights)
    if use_mask:
        bytes_accessed += 4 * int(mask_f.size)

    out = pl.pallas_call(
        kernel,
        out_shape=jax.ShapeDtypeStruct((B, T, Cp), jnp.float32),
        grid_spec=pltpu.PrefetchScalarGridSpec(
            num_scalar_prefetch=0,
            grid=(B,),
            in_specs=in_specs,
            out_specs=pl.BlockSpec((1, T, Cp), lambda b: (b, 0, 0))),
        compiler_params=pltpu.CompilerParams(
            dimension_semantics=("parallel",)),
        cost_estimate=pl.CostEstimate(flops=flops, transcendentals=trans,
                                      bytes_accessed=bytes_accessed),
    )(*args)
    return out[:, :, :prep['output_dims']]             # strip lane padding


# ----------------------------- parameter setup --------------------------------
def init_ts_encoder_params(key, input_dims, output_dims, hidden_dims=64, depth=10):
    channels = [hidden_dims] * depth + [output_dims]
    keys = list(jax.random.split(key, 2 + 6 * len(channels)))
    ki = iter(keys)

    def dense(k, shape, fan_in):
        return jax.random.normal(k, shape, jnp.float32) / jnp.sqrt(float(fan_in))

    params = {
        'output_dims': output_dims,
        'fc_w': dense(next(ki), (input_dims, hidden_dims), input_dims),   # torch W.T
        'fc_b': dense(next(ki), (1, hidden_dims), hidden_dims),
        'blocks': [],
    }
    in_ch = hidden_dims
    for i, out_ch in enumerate(channels):
        final = (i == len(channels) - 1)
        blk = {
            'dilation': 2 ** i,
            # torch Conv1d weight (out, in, 3) stored tap-major as (3, in, out);
            # tap k maps to input offset (k - 1) * dilation.
            'w1': dense(next(ki), (3, in_ch, out_ch), 3 * in_ch),
            'b1': dense(next(ki), (1, out_ch), out_ch),
            'w2': dense(next(ki), (3, out_ch, out_ch), 3 * out_ch),
            'b2': dense(next(ki), (1, out_ch), out_ch),
        }
        kp, kpb = next(ki), next(ki)
        if in_ch != out_ch or final:
            blk['pw'] = dense(kp, (in_ch, out_ch), in_ch)                 # 1x1 conv
            blk['pb'] = dense(kpb, (1, out_ch), out_ch)
        else:
            blk['pw'] = None
            blk['pb'] = None
        params['blocks'].append(blk)
        in_ch = out_ch
    return params


def prepare_params(params, lane=128):
    """bf16 matmul weights; stack the hidden->hidden blocks; pad the final block's
    output channels to a lane multiple so the only HBM store is lane-dense."""
    blocks = params['blocks']
    depth = len(blocks) - 1

    prep = {
        'output_dims': params['output_dims'],
        'depth': depth,
        'fc_w': params['fc_w'].astype(jnp.bfloat16),
        'fc_b': params['fc_b'],
    }

    if depth > 0:
        for blk in blocks[:-1]:
            assert blk['pw'] is None, "hidden->hidden blocks have no projector"
        prep['w1m'] = jnp.stack([b['w1'] for b in blocks[:-1]]).astype(jnp.bfloat16)
        prep['b1m'] = jnp.stack([b['b1'] for b in blocks[:-1]])
        prep['w2m'] = jnp.stack([b['w2'] for b in blocks[:-1]]).astype(jnp.bfloat16)
        prep['b2m'] = jnp.stack([b['b2'] for b in blocks[:-1]])

    fin = blocks[-1]
    cout = params['output_dims']
    cout_p = _round_up(cout, lane)
    pad_o = cout_p - cout
    w1, b1, w2, b2, pw, pb = (fin['w1'], fin['b1'], fin['w2'], fin['b2'],
                              fin['pw'], fin['pb'])
    if pad_o:
        w1 = jnp.pad(w1, ((0, 0), (0, 0), (0, pad_o)))
        b1 = jnp.pad(b1, ((0, 0), (0, pad_o)))
        w2 = jnp.pad(w2, ((0, 0), (0, pad_o), (0, pad_o)))
        b2 = jnp.pad(b2, ((0, 0), (0, pad_o)))
        pw = jnp.pad(pw, ((0, 0), (0, pad_o)))
        pb = jnp.pad(pb, ((0, 0), (0, pad_o)))
    prep['w1f'] = w1.astype(jnp.bfloat16)
    prep['b1f'] = b1
    prep['w2f'] = w2.astype(jnp.bfloat16)
    prep['b2f'] = b2
    prep['pwf'] = pw.astype(jnp.bfloat16)
    prep['pbf'] = pb
    return prep


# --------------------------------- forward ------------------------------------
def ts_encoder_forward(prep, x, mask_mode='all_true', key=None):
    B, T, _ = x.shape
    if mask_mode == 'all_true':
        mask_f = None                     # eval path: keep-mask folds into nan_mask
    elif mask_mode == 'all_false':
        mask_f = jnp.zeros((B, T, 1), jnp.float32)
    elif mask_mode == 'mask_last':
        mask_f = jnp.ones((B, T, 1), jnp.float32).at[:, -1, :].set(0.0)
    elif mask_mode == 'binomial':
        mask_f = jax.random.bernoulli(key, 0.5, (B, T, 1)).astype(jnp.float32)
    else:
        # TODO(synk): 'continuous' mask mode (stateful numpy loop) not ported.
        raise ValueError(f"unsupported mask mode: {mask_mode}")
    # TODO(synk): repr_dropout is identity in eval mode; training-mode dropout RNG not implemented.
    return ts_encoder_apply(prep, x, mask_f)


# ------------------------- pure-JAX f32 reference -----------------------------
def _reference_forward(params, x):
    gelu = lambda v: 0.5 * v * (1.0 + _erf_exact(v * 0.7071067811865476))
    nan_mask = ~jnp.any(jnp.isnan(x), axis=-1, keepdims=True)
    x = jnp.where(nan_mask, x, 0.0)
    h = x @ params['fc_w'] + params['fc_b']
    h = jnp.where(nan_mask, h, 0.0)                      # 'all_true' mask & nan_mask

    def dconv(v, w, b, d):                               # v (B,T,C), w (3,Cin,Cout)
        T = v.shape[1]
        vp = jnp.pad(v, ((0, 0), (d, d), (0, 0)))
        out = b
        for k in range(3):
            out = out + jnp.einsum('btc,cd->btd', vp[:, k * d:k * d + T], w[k])
        return out

    for blk in params['blocks']:
        d = blk['dilation']
        res = h if blk['pw'] is None else h @ blk['pw'] + blk['pb']
        h = dconv(gelu(h), blk['w1'], blk['b1'], d)
        h = dconv(gelu(h), blk['w2'], blk['b2'], d) + res
    return h


# ----------------------------------- main --------------------------------------
if __name__ == "__main__":
    B, T = 2, 16
    input_dims, hidden_dims, output_dims, depth = 4, 32, 16, 2

    key = jax.random.PRNGKey(0)
    k_params, k_x = jax.random.split(key)

    params = init_ts_encoder_params(k_params, input_dims, output_dims,
                                    hidden_dims=hidden_dims, depth=depth)
    prep = prepare_params(params)

    x = jax.random.normal(k_x, (B, T, input_dims), jnp.float32)
    x = x.at[0, 3, :].set(jnp.nan)        # exercise the nan_mask path

    out = ts_encoder_forward(prep, x, mask_mode='all_true')
    out = jax.block_until_ready(out)

    assert out.shape == (B, T, output_dims), out.shape
    assert bool(jnp.all(jnp.isfinite(out)))

    ref = _reference_forward(params, x)
    err = float(jnp.max(jnp.abs(out - ref)))
    tol = 5e-2 * float(jnp.max(jnp.abs(ref))) + 5e-2     # generous bf16 tolerance
    assert err < tol, f"max abs error {err} > {tol}"

    print("KERNEL_OK")
</pallas_src>

<mosaic_0001>
module attributes {stable_mosaic.version = 11 : i64} {
  func.func @kernel(%arg0: i32, %arg1: memref<1x16x4xf32, #tpu.memory_space<vmem>>, %arg2: memref<4x32xbf16, #tpu.memory_space<vmem>>, %arg3: memref<1x32xf32, #tpu.memory_space<vmem>>, %arg4: memref<2x3x32x32xbf16, #tpu.memory_space<vmem>>, %arg5: memref<2x1x32xf32, #tpu.memory_space<vmem>>, %arg6: memref<2x3x32x32xbf16, #tpu.memory_space<vmem>>, %arg7: memref<2x1x32xf32, #tpu.memory_space<vmem>>, %arg8: memref<3x32x128xbf16, #tpu.memory_space<vmem>>, %arg9: memref<1x128xf32, #tpu.memory_space<vmem>>, %arg10: memref<3x128x128xbf16, #tpu.memory_space<vmem>>, %arg11: memref<1x128xf32, #tpu.memory_space<vmem>>, %arg12: memref<32x128xbf16, #tpu.memory_space<vmem>>, %arg13: memref<1x128xf32, #tpu.memory_space<vmem>>, %arg14: memref<1x16x128xf32, #tpu.memory_space<vmem>>) attributes {dimension_semantics = [#tpu.dimension_semantics<parallel>], iteration_bounds = array<i64: 2>, scalar_prefetch = 0 : i64, scratch_operands = 0 : i64, tpu.core_type = #tpu.core_type<tc>, window_params = [{transform_indices = @transform_0, window_bounds = array<i64: 1, 16, 4>}, {pipeline_mode = #tpu.pipeline_mode<synchronous>, transform_indices = @transform_1, window_bounds = array<i64: 4, 32>}, {pipeline_mode = #tpu.pipeline_mode<synchronous>, transform_indices = @transform_2, window_bounds = array<i64: 1, 32>}, {pipeline_mode = #tpu.pipeline_mode<synchronous>, transform_indices = @transform_3, window_bounds = array<i64: 2, 3, 32, 32>}, {pipeline_mode = #tpu.pipeline_mode<synchronous>, transform_indices = @transform_4, window_bounds = array<i64: 2, 1, 32>}, {pipeline_mode = #tpu.pipeline_mode<synchronous>, transform_indices = @transform_5, window_bounds = array<i64: 2, 3, 32, 32>}, {pipeline_mode = #tpu.pipeline_mode<synchronous>, transform_indices = @transform_6, window_bounds = array<i64: 2, 1, 32>}, {pipeline_mode = #tpu.pipeline_mode<synchronous>, transform_indices = @transform_7, window_bounds = array<i64: 3, 32, 128>}, {pipeline_mode = #tpu.pipeline_mode<synchronous>, transform_indices = @transform_8, window_bounds = array<i64: 1, 128>}, {pipeline_mode = #tpu.pipeline_mode<synchronous>, transform_indices = @transform_9, window_bounds = array<i64: 3, 128, 128>}, {pipeline_mode = #tpu.pipeline_mode<synchronous>, transform_indices = @transform_10, window_bounds = array<i64: 1, 128>}, {pipeline_mode = #tpu.pipeline_mode<synchronous>, transform_indices = @transform_11, window_bounds = array<i64: 32, 128>}, {pipeline_mode = #tpu.pipeline_mode<synchronous>, transform_indices = @transform_12, window_bounds = array<i64: 1, 128>}, {transform_indices = @transform_13, window_bounds = array<i64: 1, 16, 128>}]} {
    %c0 = arith.constant 0 : index
    %c0_0 = arith.constant 0 : index
    %c0_1 = arith.constant 0 : index
    %0 = vector.load %arg1[%c0, %c0_0, %c0_1] : memref<1x16x4xf32, #tpu.memory_space<vmem>>, vector<1x16x4xf32>
    %1 = vector.shape_cast %0 : vector<1x16x4xf32> to vector<16x4xf32>
    %2 = arith.cmpf one, %1, %1 : vector<16x4xf32>
    %cst = arith.constant 1.000000e+00 : f32
    %cst_2 = arith.constant 0.000000e+00 : f32
    %3 = vector.broadcast %cst : f32 to vector<16x4xf32>
    %4 = vector.broadcast %cst_2 : f32 to vector<16x4xf32>
    %5 = arith.select %2, %3, %4 : vector<16x4xi1>, vector<16x4xf32>
    %cst_3 = arith.constant dense<0xFF800000> : vector<16xf32>
    %6 = vector.multi_reduction <maximumf>, %5, %cst_3 [1] : vector<16x4xf32> to vector<16xf32>
    %7 = vector.shape_cast %6 : vector<16xf32> to vector<16x1xf32>
    %cst_4 = arith.constant 5.000000e-01 : f32
    %8 = vector.broadcast %cst_4 : f32 to vector<16x1xf32>
    %9 = arith.cmpf olt, %7, %8 : vector<16x1xf32>
    %cst_5 = arith.constant 0.000000e+00 : f32
    %10 = vector.shape_cast %9 : vector<16x1xi1> to vector<16x1xi1>
    %11 = vector.broadcast %10 : vector<16x1xi1> to vector<16x4xi1>
    %12 = vector.broadcast %cst_5 : f32 to vector<16x4xf32>
    %13 = arith.select %11, %1, %12 : vector<16x4xi1>, vector<16x4xf32>
    %14 = arith.truncf %13 : vector<16x4xf32> to vector<16x4xbf16>
    %c0_6 = arith.constant 0 : index
    %c0_7 = arith.constant 0 : index
    %15 = vector.load %arg2[%c0_6, %c0_7] : memref<4x32xbf16, #tpu.memory_space<vmem>>, vector<4x32xbf16>
    %cst_8 = arith.constant dense<0.000000e+00> : vector<16x32xf32>
    %16 = tpu.matmul %14, %15, %cst_8 {dimension_numbers = #tpu.dot_dimension_numbers<[1], [0], [0], [1], [0, 0, 1, 1], [], []>} : vector<16x4xbf16>, vector<4x32xbf16>, vector<16x32xf32> -> vector<16x32xf32>
    %c0_9 = arith.constant 0 : index
    %c0_10 = arith.constant 0 : index
    %17 = vector.load %arg3[%c0_9, %c0_10] : memref<1x32xf32, #tpu.memory_space<vmem>>, vector<1x32xf32>
    %18 = vector.broadcast %17 : vector<1x32xf32> to vector<16x32xf32>
    %19 = arith.addf %16, %18 : vector<16x32xf32>
    %cst_11 = arith.constant 0.000000e+00 : f32
    %20 = vector.shape_cast %9 : vector<16x1xi1> to vector<16x1xi1>
    %21 = vector.broadcast %20 : vector<16x1xi1> to vector<16x32xi1>
    %22 = vector.broadcast %cst_11 : f32 to vector<16x32xf32>
    %23 = arith.select %21, %19, %22 : vector<16x32xi1>, vector<16x32xf32>
    %cst_12 = arith.constant 5.000000e-01 : f32
    %24 = vector.broadcast %cst_12 : f32 to vector<16x32xf32>
    %25 = arith.mulf %24, %23 : vector<16x32xf32>
    %cst_13 = arith.constant 0.707106769 : f32
    %26 = vector.broadcast %cst_13 : f32 to vector<16x32xf32>
    %27 = arith.mulf %23, %26 : vector<16x32xf32>
    %28 = math.absf %27 : vector<16x32xf32>
    %cst_14 = arith.constant 0.327591091 : f32
    %29 = vector.broadcast %cst_14 : f32 to vector<16x32xf32>
    %30 = arith.mulf %29, %28 : vector<16x32xf32>
    %cst_15 = arith.constant 1.000000e+00 : f32
    %31 = vector.broadcast %cst_15 : f32 to vector<16x32xf32>
    %32 = arith.addf %31, %30 : vector<16x32xf32>
    %cst_16 = arith.constant 1.000000e+00 : f32
    %33 = vector.broadcast %cst_16 : f32 to vector<16x32xf32>
    %34 = arith.divf %33, %32 : vector<16x32xf32>
    %cst_17 = arith.constant 1.06140542 : f32
    %35 = vector.broadcast %cst_17 : f32 to vector<16x32xf32>
    %36 = arith.mulf %35, %34 : vector<16x32xf32>
    %cst_18 = arith.constant -1.45315206 : f32
    %37 = vector.broadcast %cst_18 : f32 to vector<16x32xf32>
    %38 = arith.addf %36, %37 : vector<16x32xf32>
    %39 = arith.mulf %38, %34 : vector<16x32xf32>
    %cst_19 = arith.constant 1.42141378 : f32
    %40 = vector.broadcast %cst_19 : f32 to vector<16x32xf32>
    %41 = arith.addf %39, %40 : vector<16x32xf32>
    %42 = arith.mulf %41, %34 : vector<16x32xf32>
    %cst_20 = arith.constant -0.284496725 : f32
    %43 = vector.broadcast %cst_20 : f32 to vector<16x32xf32>
    %44 = arith.addf %42, %43 : vector<16x32xf32>
    %45 = arith.mulf %44, %34 : vector<16x32xf32>
    %cst_21 = arith.constant 0.254829586 : f32
    %46 = vector.broadcast %cst_21 : f32 to vector<16x32xf32>
    %47 = arith.addf %45, %46 : vector<16x32xf32>
    %48 = arith.mulf %47, %34 : vector<16x32xf32>
    %49 = arith.mulf %28, %28 : vector<16x32xf32>
    %cst_22 = arith.constant 0.000000e+00 : f32
    %50 = vector.broadcast %cst_22 : f32 to vector<16x32xf32>
    %51 = arith.subf %50, %49 : vector<16x32xf32>
    %52 = math.exp %51 : vector<16x32xf32>
    %53 = arith.mulf %48, %52 : vector<16x32xf32>
    %cst_23 = arith.constant 1.000000e+00 : f32
    %54 = vector.broadcast %cst_23 : f32 to vector<16x32xf32>
    %55 = arith.subf %54, %53 : vector<16x32xf32>
    %cst_24 = arith.constant 0.000000e+00 : f32
    %56 = vector.broadcast %cst_24 : f32 to vector<16x32xf32>
    %57 = arith.cmpf olt, %27, %56 : vector<16x32xf32>
    %cst_25 = arith.constant 0.000000e+00 : f32
    %58 = vector.broadcast %cst_25 : f32 to vector<16x32xf32>
    %59 = arith.subf %58, %55 : vector<16x32xf32>
    %60 = arith.select %57, %59, %55 : vector<16x32xi1>, vector<16x32xf32>
    %cst_26 = arith.constant 1.000000e+00 : f32
    %61 = vector.broadcast %cst_26 : f32 to vector<16x32xf32>
    %62 = arith.addf %61, %60 : vector<16x32xf32>
    %63 = arith.mulf %25, %62 : vector<16x32xf32>
    %64 = arith.truncf %63 : vector<16x32xf32> to vector<16x32xbf16>
    %c0_27 = arith.constant 0 : index
    %c0_28 = arith.constant 0 : index
    %c0_29 = arith.constant 0 : index
    %65 = vector.load %arg5[%c0_27, %c0_28, %c0_29] : memref<2x1x32xf32, #tpu.memory_space<vmem>>, vector<1x1x32xf32>
    %66 = vector.shape_cast %65 : vector<1x1x32xf32> to vector<1x32xf32>
    %c0_30 = arith.constant 0 : index
    %c1 = arith.constant 1 : index
    %c0_31 = arith.constant 0 : index
    %c0_32 = arith.constant 0 : index
    %67 = vector.load %arg4[%c0_30, %c1, %c0_31, %c0_32] : memref<2x3x32x32xbf16, #tpu.memory_space<vmem>>, vector<1x1x32x32xbf16>
    %68 = vector.shape_cast %67 : vector<1x1x32x32xbf16> to vector<32x32xbf16>
    %cst_33 = arith.constant dense<0.000000e+00> : vector<16x32xf32>
    %69 = tpu.matmul %64, %68, %cst_33 {dimension_numbers = #tpu.dot_dimension_numbers<[1], [0], [0], [1], [0, 0, 1, 1], [], []>} : vector<16x32xbf16>, vector<32x32xbf16>, vector<16x32xf32> -> vector<16x32xf32>
    %cst_34 = arith.constant 0.000000e+00 : bf16
    %70 = vector.broadcast %cst_34 : bf16 to vector<1x32xbf16>
    %71 = vector.extract_strided_slice %64 {offsets = [0, 0], sizes = [15, 32], strides = [1, 1]} : vector<16x32xbf16> to vector<15x32xbf16>
    %72 = tpu.concatenate %70, %71 in 0 : vector<1x32xbf16>, vector<15x32xbf16> -> vector<16x32xbf16>
    %73 = vector.extract_strided_slice %64 {offsets = [1, 0], sizes = [15, 32], strides = [1, 1]} : vector<16x32xbf16> to vector<15x32xbf16>
    %74 = tpu.concatenate %73, %70 in 0 : vector<15x32xbf16>, vector<1x32xbf16> -> vector<16x32xbf16>
    %c0_35 = arith.constant 0 : index
    %c0_36 = arith.constant 0 : index
    %c0_37 = arith.constant 0 : index
    %c0_38 = arith.constant 0 : index
    %75 = vector.load %arg4[%c0_35, %c0_36, %c0_37, %c0_38] : memref<2x3x32x32xbf16, #tpu.memory_space<vmem>>, vector<1x1x32x32xbf16>
    %76 = vector.shape_cast %75 : vector<1x1x32x32xbf16> to vector<32x32xbf16>
    %cst_39 = arith.constant dense<0.000000e+00> : vector<16x32xf32>
    %77 = tpu.matmul %72, %76, %cst_39 {dimension_numbers = #tpu.dot_dimension_numbers<[1], [0], [0], [1], [0, 0, 1, 1], [], []>} : vector<16x32xbf16>, vector<32x32xbf16>, vector<16x32xf32> -> vector<16x32xf32>
    %78 = arith.addf %69, %77 : vector<16x32xf32>
    %c0_40 = arith.constant 0 : index
    %c2 = arith.constant 2 : index
    %c0_41 = arith.constant 0 : index
    %c0_42 = arith.constant 0 : index
    %79 = vector.load %arg4[%c0_40, %c2, %c0_41, %c0_42] : memref<2x3x32x32xbf16, #tpu.memory_space<vmem>>, vector<1x1x32x32xbf16>
    %80 = vector.shape_cast %79 : vector<1x1x32x32xbf16> to vector<32x32xbf16>
    %cst_43 = arith.constant dense<0.000000e+00> : vector<16x32xf32>
    %81 = tpu.matmul %74, %80, %cst_43 {dimension_numbers = #tpu.dot_dimension_numbers<[1], [0], [0], [1], [0, 0, 1, 1], [], []>} : vector<16x32xbf16>, vector<32x32xbf16>, vector<16x32xf32> -> vector<16x32xf32>
    %82 = arith.addf %78, %81 : vector<16x32xf32>
    %83 = vector.broadcast %66 : vector<1x32xf32> to vector<16x32xf32>
    %84 = arith.addf %82, %83 : vector<16x32xf32>
    %cst_44 = arith.constant 5.000000e-01 : f32
    %85 = vector.broadcast %cst_44 : f32 to vector<16x32xf32>
    %86 = arith.mulf %85, %84 : vector<16x32xf32>
    %cst_45 = arith.constant 0.707106769 : f32
    %87 = vector.broadcast %cst_45 : f32 to vector<16x32xf32>
    %88 = arith.mulf %84, %87 : vector<16x32xf32>
    %89 = math.absf %88 : vector<16x32xf32>
    %cst_46 = arith.constant 0.327591091 : f32
    %90 = vector.broadcast %cst_46 : f32 to vector<16x32xf32>
    %91 = arith.mulf %90, %89 : vector<16x32xf32>
    %cst_47 = arith.constant 1.000000e+00 : f32
    %92 = vector.broadcast %cst_47 : f32 to vector<16x32xf32>
    %93 = arith.addf %92, %91 : vector<16x32xf32>
    %cst_48 = arith.constant 1.000000e+00 : f32
    %94 = vector.broadcast %cst_48 : f32 to vector<16x32xf32>
    %95 = arith.divf %94, %93 : vector<16x32xf32>
    %cst_49 = arith.constant 1.06140542 : f32
    %96 = vector.broadcast %cst_49 : f32 to vector<16x32xf32>
    %97 = arith.mulf %96, %95 : vector<16x32xf32>
    %cst_50 = arith.constant -1.45315206 : f32
    %98 = vector.broadcast %cst_50 : f32 to vector<16x32xf32>
    %99 = arith.addf %97, %98 : vector<16x32xf32>
    %100 = arith.mulf %99, %95 : vector<16x32xf32>
    %cst_51 = arith.constant 1.42141378 : f32
    %101 = vector.broadcast %cst_51 : f32 to vector<16x32xf32>
    %102 = arith.addf %100, %101 : vector<16x32xf32>
    %103 = arith.mulf %102, %95 : vector<16x32xf32>
    %cst_52 = arith.constant -0.284496725 : f32
    %104 = vector.broadcast %cst_52 : f32 to vector<16x32xf32>
    %105 = arith.addf %103, %104 : vector<16x32xf32>
    %106 = arith.mulf %105, %95 : vector<16x32xf32>
    %cst_53 = arith.constant 0.254829586 : f32
    %107 = vector.broadcast %cst_53 : f32 to vector<16x32xf32>
    %108 = arith.addf %106, %107 : vector<16x32xf32>
    %109 = arith.mulf %108, %95 : vector<16x32xf32>
    %110 = arith.mulf %89, %89 : vector<16x32xf32>
    %cst_54 = arith.constant 0.000000e+00 : f32
    %111 = vector.broadcast %cst_54 : f32 to vector<16x32xf32>
    %112 = arith.subf %111, %110 : vector<16x32xf32>
    %113 = math.exp %112 : vector<16x32xf32>
    %114 = arith.mulf %109, %113 : vector<16x32xf32>
    %cst_55 = arith.constant 1.000000e+00 : f32
    %115 = vector.broadcast %cst_55 : f32 to vector<16x32xf32>
    %116 = arith.subf %115, %114 : vector<16x32xf32>
    %cst_56 = arith.constant 0.000000e+00 : f32
    %117 = vector.broadcast %cst_56 : f32 to vector<16x32xf32>
    %118 = arith.cmpf olt, %88, %117 : vector<16x32xf32>
    %cst_57 = arith.constant 0.000000e+00 : f32
    %119 = vector.broadcast %cst_57 : f32 to vector<16x32xf32>
    %120 = arith.subf %119, %116 : vector<16x32xf32>
    %121 = arith.select %118, %120, %116 : vector<16x32xi1>, vector<16x32xf32>
    %cst_58 = arith.constant 1.000000e+00 : f32
    %122 = vector.broadcast %cst_58 : f32 to vector<16x32xf32>
    %123 = arith.addf %122, %121 : vector<16x32xf32>
    %124 = arith.mulf %86, %123 : vector<16x32xf32>
    %125 = arith.truncf %124 : vector<16x32xf32> to vector<16x32xbf16>
    %c0_59 = arith.constant 0 : index
    %c0_60 = arith.constant 0 : index
    %c0_61 = arith.constant 0 : index
    %126 = vector.load %arg7[%c0_59, %c0_60, %c0_61] : memref<2x1x32xf32, #tpu.memory_space<vmem>>, vector<1x1x32xf32>
    %127 = vector.shape_cast %126 : vector<1x1x32xf32> to vector<1x32xf32>
    %c0_62 = arith.constant 0 : index
    %c1_63 = arith.constant 1 : index
    %c0_64 = arith.constant 0 : index
    %c0_65 = arith.constant 0 : index
    %128 = vector.load %arg6[%c0_62, %c1_63, %c0_64, %c0_65] : memref<2x3x32x32xbf16, #tpu.memory_space<vmem>>, vector<1x1x32x32xbf16>
    %129 = vector.shape_cast %128 : vector<1x1x32x32xbf16> to vector<32x32xbf16>
    %cst_66 = arith.constant dense<0.000000e+00> : vector<16x32xf32>
    %130 = tpu.matmul %125, %129, %cst_66 {dimension_numbers = #tpu.dot_dimension_numbers<[1], [0], [0], [1], [0, 0, 1, 1], [], []>} : vector<16x32xbf16>, vector<32x32xbf16>, vector<16x32xf32> -> vector<16x32xf32>
    %cst_67 = arith.constant 0.000000e+00 : bf16
    %131 = vector.broadcast %cst_67 : bf16 to vector<1x32xbf16>
    %132 = vector.extract_strided_slice %125 {offsets = [0, 0], sizes = [15, 32], strides = [1, 1]} : vector<16x32xbf16> to vector<15x32xbf16>
    %133 = tpu.concatenate %131, %132 in 0 : vector<1x32xbf16>, vector<15x32xbf16> -> vector<16x32xbf16>
    %134 = vector.extract_strided_slice %125 {offsets = [1, 0], sizes = [15, 32], strides = [1, 1]} : vector<16x32xbf16> to vector<15x32xbf16>
    %135 = tpu.concatenate %134, %131 in 0 : vector<15x32xbf16>, vector<1x32xbf16> -> vector<16x32xbf16>
    %c0_68 = arith.constant 0 : index
    %c0_69 = arith.constant 0 : index
    %c0_70 = arith.constant 0 : index
    %c0_71 = arith.constant 0 : index
    %136 = vector.load %arg6[%c0_68, %c0_69, %c0_70, %c0_71] : memref<2x3x32x32xbf16, #tpu.memory_space<vmem>>, vector<1x1x32x32xbf16>
    %137 = vector.shape_cast %136 : vector<1x1x32x32xbf16> to vector<32x32xbf16>
    %cst_72 = arith.constant dense<0.000000e+00> : vector<16x32xf32>
    %138 = tpu.matmul %133, %137, %cst_72 {dimension_numbers = #tpu.dot_dimension_numbers<[1], [0], [0], [1], [0, 0, 1, 1], [], []>} : vector<16x32xbf16>, vector<32x32xbf16>, vector<16x32xf32> -> vector<16x32xf32>
    %139 = arith.addf %130, %138 : vector<16x32xf32>
    %c0_73 = arith.constant 0 : index
    %c2_74 = arith.constant 2 : index
    %c0_75 = arith.constant 0 : index
    %c0_76 = arith.constant 0 : index
    %140 = vector.load %arg6[%c0_73, %c2_74, %c0_75, %c0_76] : memref<2x3x32x32xbf16, #tpu.memory_space<vmem>>, vector<1x1x32x32xbf16>
    %141 = vector.shape_cast %140 : vector<1x1x32x32xbf16> to vector<32x32xbf16>
    %cst_77 = arith.constant dense<0.000000e+00> : vector<16x32xf32>
    %142 = tpu.matmul %135, %141, %cst_77 {dimension_numbers = #tpu.dot_dimension_numbers<[1], [0], [0], [1], [0, 0, 1, 1], [], []>} : vector<16x32xbf16>, vector<32x32xbf16>, vector<16x32xf32> -> vector<16x32xf32>
    %143 = arith.addf %139, %142 : vector<16x32xf32>
    %144 = vector.broadcast %127 : vector<1x32xf32> to vector<16x32xf32>
    %145 = arith.addf %143, %144 : vector<16x32xf32>
    %146 = arith.addf %145, %23 : vector<16x32xf32>
    %cst_78 = arith.constant 5.000000e-01 : f32
    %147 = vector.broadcast %cst_78 : f32 to vector<16x32xf32>
    %148 = arith.mulf %147, %146 : vector<16x32xf32>
    %cst_79 = arith.constant 0.707106769 : f32
    %149 = vector.broadcast %cst_79 : f32 to vector<16x32xf32>
    %150 = arith.mulf %146, %149 : vector<16x32xf32>
    %151 = math.absf %150 : vector<16x32xf32>
    %cst_80 = arith.constant 0.327591091 : f32
    %152 = vector.broadcast %cst_80 : f32 to vector<16x32xf32>
    %153 = arith.mulf %152, %151 : vector<16x32xf32>
    %cst_81 = arith.constant 1.000000e+00 : f32
    %154 = vector.broadcast %cst_81 : f32 to vector<16x32xf32>
    %155 = arith.addf %154, %153 : vector<16x32xf32>
    %cst_82 = arith.constant 1.000000e+00 : f32
    %156 = vector.broadcast %cst_82 : f32 to vector<16x32xf32>
    %157 = arith.divf %156, %155 : vector<16x32xf32>
    %cst_83 = arith.constant 1.06140542 : f32
    %158 = vector.broadcast %cst_83 : f32 to vector<16x32xf32>
    %159 = arith.mulf %158, %157 : vector<16x32xf32>
    %cst_84 = arith.constant -1.45315206 : f32
    %160 = vector.broadcast %cst_84 : f32 to vector<16x32xf32>
    %161 = arith.addf %159, %160 : vector<16x32xf32>
    %162 = arith.mulf %161, %157 : vector<16x32xf32>
    %cst_85 = arith.constant 1.42141378 : f32
    %163 = vector.broadcast %cst_85 : f32 to vector<16x32xf32>
    %164 = arith.addf %162, %163 : vector<16x32xf32>
    %165 = arith.mulf %164, %157 : vector<16x32xf32>
    %cst_86 = arith.constant -0.284496725 : f32
    %166 = vector.broadcast %cst_86 : f32 to vector<16x32xf32>
    %167 = arith.addf %165, %166 : vector<16x32xf32>
    %168 = arith.mulf %167, %157 : vector<16x32xf32>
    %cst_87 = arith.constant 0.254829586 : f32
    %169 = vector.broadcast %cst_87 : f32 to vector<16x32xf32>
    %170 = arith.addf %168, %169 : vector<16x32xf32>
    %171 = arith.mulf %170, %157 : vector<16x32xf32>
    %172 = arith.mulf %151, %151 : vector<16x32xf32>
    %cst_88 = arith.constant 0.000000e+00 : f32
    %173 = vector.broadcast %cst_88 : f32 to vector<16x32xf32>
    %174 = arith.subf %173, %172 : vector<16x32xf32>
    %175 = math.exp %174 : vector<16x32xf32>
    %176 = arith.mulf %171, %175 : vector<16x32xf32>
    %cst_89 = arith.constant 1.000000e+00 : f32
    %177 = vector.broadcast %cst_89 : f32 to vector<16x32xf32>
    %178 = arith.subf %177, %176 : vector<16x32xf32>
    %cst_90 = arith.constant 0.000000e+00 : f32
    %179 = vector.broadcast %cst_90 : f32 to vector<16x32xf32>
    %180 = arith.cmpf olt, %150, %179 : vector<16x32xf32>
    %cst_91 = arith.constant 0.000000e+00 : f32
    %181 = vector.broadcast %cst_91 : f32 to vector<16x32xf32>
    %182 = arith.subf %181, %178 : vector<16x32xf32>
    %183 = arith.select %180, %182, %178 : vector<16x32xi1>, vector<16x32xf32>
    %cst_92 = arith.constant 1.000000e+00 : f32
    %184 = vector.broadcast %cst_92 : f32 to vector<16x32xf32>
    %185 = arith.addf %184, %183 : vector<16x32xf32>
    %186 = arith.mulf %148, %185 : vector<16x32xf32>
    %187 = arith.truncf %186 : vector<16x32xf32> to vector<16x32xbf16>
    %c1_93 = arith.constant 1 : index
    %c0_94 = arith.constant 0 : index
    %c0_95 = arith.constant 0 : index
    %188 = vector.load %arg5[%c1_93, %c0_94, %c0_95] : memref<2x1x32xf32, #tpu.memory_space<vmem>>, vector<1x1x32xf32>
    %189 = vector.shape_cast %188 : vector<1x1x32xf32> to vector<1x32xf32>
    %c1_96 = arith.constant 1 : index
    %c1_97 = arith.constant 1 : index
    %c0_98 = arith.constant 0 : index
    %c0_99 = arith.constant 0 : index
    %190 = vector.load %arg4[%c1_96, %c1_97, %c0_98, %c0_99] : memref<2x3x32x32xbf16, #tpu.memory_space<vmem>>, vector<1x1x32x32xbf16>
    %191 = vector.shape_cast %190 : vector<1x1x32x32xbf16> to vector<32x32xbf16>
    %cst_100 = arith.constant dense<0.000000e+00> : vector<16x32xf32>
    %192 = tpu.matmul %187, %191, %cst_100 {dimension_numbers = #tpu.dot_dimension_numbers<[1], [0], [0], [1], [0, 0, 1, 1], [], []>} : vector<16x32xbf16>, vector<32x32xbf16>, vector<16x32xf32> -> vector<16x32xf32>
    %cst_101 = arith.constant 0.000000e+00 : bf16
    %193 = vector.broadcast %cst_101 : bf16 to vector<2x32xbf16>
    %194 = vector.extract_strided_slice %187 {offsets = [0, 0], sizes = [14, 32], strides = [1, 1]} : vector<16x32xbf16> to vector<14x32xbf16>
    %195 = tpu.concatenate %193, %194 in 0 : vector<2x32xbf16>, vector<14x32xbf16> -> vector<16x32xbf16>
    %196 = vector.extract_strided_slice %187 {offsets = [2, 0], sizes = [14, 32], strides = [1, 1]} : vector<16x32xbf16> to vector<14x32xbf16>
    %197 = tpu.concatenate %196, %193 in 0 : vector<14x32xbf16>, vector<2x32xbf16> -> vector<16x32xbf16>
    %c1_102 = arith.constant 1 : index
    %c0_103 = arith.constant 0 : index
    %c0_104 = arith.constant 0 : index
    %c0_105 = arith.constant 0 : index
    %198 = vector.load %arg4[%c1_102, %c0_103, %c0_104, %c0_105] : memref<2x3x32x32xbf16, #tpu.memory_space<vmem>>, vector<1x1x32x32xbf16>
    %199 = vector.shape_cast %198 : vector<1x1x32x32xbf16> to vector<32x32xbf16>
    %cst_106 = arith.constant dense<0.000000e+00> : vector<16x32xf32>
    %200 = tpu.matmul %195, %199, %cst_106 {dimension_numbers = #tpu.dot_dimension_numbers<[1], [0], [0], [1], [0, 0, 1, 1], [], []>} : vector<16x32xbf16>, vector<32x32xbf16>, vector<16x32xf32> -> vector<16x32xf32>
    %201 = arith.addf %192, %200 : vector<16x32xf32>
    %c1_107 = arith.constant 1 : index
    %c2_108 = arith.constant 2 : index
    %c0_109 = arith.constant 0 : index
    %c0_110 = arith.constant 0 : index
    %202 = vector.load %arg4[%c1_107, %c2_108, %c0_109, %c0_110] : memref<2x3x32x32xbf16, #tpu.memory_space<vmem>>, vector<1x1x32x32xbf16>
    %203 = vector.shape_cast %202 : vector<1x1x32x32xbf16> to vector<32x32xbf16>
    %cst_111 = arith.constant dense<0.000000e+00> : vector<16x32xf32>
    %204 = tpu.matmul %197, %203, %cst_111 {dimension_numbers = #tpu.dot_dimension_numbers<[1], [0], [0], [1], [0, 0, 1, 1], [], []>} : vector<16x32xbf16>, vector<32x32xbf16>, vector<16x32xf32> -> vector<16x32xf32>
    %205 = arith.addf %201, %204 : vector<16x32xf32>
    %206 = vector.broadcast %189 : vector<1x32xf32> to vector<16x32xf32>
    %207 = arith.addf %205, %206 : vector<16x32xf32>
    %cst_112 = arith.constant 5.000000e-01 : f32
    %208 = vector.broadcast %cst_112 : f32 to vector<16x32xf32>
    %209 = arith.mulf %208, %207 : vector<16x32xf32>
    %cst_113 = arith.constant 0.707106769 : f32
    %210 = vector.broadcast %cst_113 : f32 to vector<16x32xf32>
    %211 = arith.mulf %207, %210 : vector<16x32xf32>
    %212 = math.absf %211 : vector<16x32xf32>
    %cst_114 = arith.constant 0.327591091 : f32
    %213 = vector.broadcast %cst_114 : f32 to vector<16x32xf32>
    %214 = arith.mulf %213, %212 : vector<16x32xf32>
    %cst_115 = arith.constant 1.000000e+00 : f32
    %215 = vector.broadcast %cst_115 : f32 to vector<16x32xf32>
    %216 = arith.addf %215, %214 : vector<16x32xf32>
    %cst_116 = arith.constant 1.000000e+00 : f32
    %217 = vector.broadcast %cst_116 : f32 to vector<16x32xf32>
    %218 = arith.divf %217, %216 : vector<16x32xf32>
    %cst_117 = arith.constant 1.06140542 : f32
    %219 = vector.broadcast %cst_117 : f32 to vector<16x32xf32>
    %220 = arith.mulf %219, %218 : vector<16x32xf32>
    %cst_118 = arith.constant -1.45315206 : f32
    %221 = vector.broadcast %cst_118 : f32 to vector<16x32xf32>
    %222 = arith.addf %220, %221 : vector<16x32xf32>
    %223 = arith.mulf %222, %218 : vector<16x32xf32>
    %cst_119 = arith.constant 1.42141378 : f32
    %224 = vector.broadcast %cst_119 : f32 to vector<16x32xf32>
    %225 = arith.addf %223, %224 : vector<16x32xf32>
    %226 = arith.mulf %225, %218 : vector<16x32xf32>
    %cst_120 = arith.constant -0.284496725 : f32
    %227 = vector.broadcast %cst_120 : f32 to vector<16x32xf32>
    %228 = arith.addf %226, %227 : vector<16x32xf32>
    %229 = arith.mulf %228, %218 : vector<16x32xf32>
    %cst_121 = arith.constant 0.254829586 : f32
    %230 = vector.broadcast %cst_121 : f32 to vector<16x32xf32>
    %231 = arith.addf %229, %230 : vector<16x32xf32>
    %232 = arith.mulf %231, %218 : vector<16x32xf32>
    %233 = arith.mulf %212, %212 : vector<16x32xf32>
    %cst_122 = arith.constant 0.000000e+00 : f32
    %234 = vector.broadcast %cst_122 : f32 to vector<16x32xf32>
    %235 = arith.subf %234, %233 : vector<16x32xf32>
    %236 = math.exp %235 : vector<16x32xf32>
    %237 = arith.mulf %232, %236 : vector<16x32xf32>
    %cst_123 = arith.constant 1.000000e+00 : f32
    %238 = vector.broadcast %cst_123 : f32 to vector<16x32xf32>
    %239 = arith.subf %238, %237 : vector<16x32xf32>
    %cst_124 = arith.constant 0.000000e+00 : f32
    %240 = vector.broadcast %cst_124 : f32 to vector<16x32xf32>
    %241 = arith.cmpf olt, %211, %240 : vector<16x32xf32>
    %cst_125 = arith.constant 0.000000e+00 : f32
    %242 = vector.broadcast %cst_125 : f32 to vector<16x32xf32>
    %243 = arith.subf %242, %239 : vector<16x32xf32>
    %244 = arith.select %241, %243, %239 : vector<16x32xi1>, vector<16x32xf32>
    %cst_126 = arith.constant 1.000000e+00 : f32
    %245 = vector.broadcast %cst_126 : f32 to vector<16x32xf32>
    %246 = arith.addf %245, %244 : vector<16x32xf32>
    %247 = arith.mulf %209, %246 : vector<16x32xf32>
    %248 = arith.truncf %247 : vector<16x32xf32> to vector<16x32xbf16>
    %c1_127 = arith.constant 1 : index
    %c0_128 = arith.constant 0 : index
    %c0_129 = arith.constant 0 : index
    %249 = vector.load %arg7[%c1_127, %c0_128, %c0_129] : memref<2x1x32xf32, #tpu.memory_space<vmem>>, vector<1x1x32xf32>
    %250 = vector.shape_cast %249 : vector<1x1x32xf32> to vector<1x32xf32>
    %c1_130 = arith.constant 1 : index
    %c1_131 = arith.constant 1 : index
    %c0_132 = arith.constant 0 : index
    %c0_133 = arith.constant 0 : index
    %251 = vector.load %arg6[%c1_130, %c1_131, %c0_132, %c0_133] : memref<2x3x32x32xbf16, #tpu.memory_space<vmem>>, vector<1x1x32x32xbf16>
    %252 = vector.shape_cast %251 : vector<1x1x32x32xbf16> to vector<32x32xbf16>
    %cst_134 = arith.constant dense<0.000000e+00> : vector<16x32xf32>
    %253 = tpu.matmul %248, %252, %cst_134 {dimension_numbers = #tpu.dot_dimension_numbers<[1], [0], [0], [1], [0, 0, 1, 1], [], []>} : vector<16x32xbf16>, vector<32x32xbf16>, vector<16x32xf32> -> vector<16x32xf32>
    %cst_135 = arith.constant 0.000000e+00 : bf16
    %254 = vector.broadcast %cst_135 : bf16 to vector<2x32xbf16>
    %255 = vector.extract_strided_slice %248 {offsets = [0, 0], sizes = [14, 32], strides = [1, 1]} : vector<16x32xbf16> to vector<14x32xbf16>
    %256 = tpu.concatenate %254, %255 in 0 : vector<2x32xbf16>, vector<14x32xbf16> -> vector<16x32xbf16>
    %257 = vector.extract_strided_slice %248 {offsets = [2, 0], sizes = [14, 32], strides = [1, 1]} : vector<16x32xbf16> to vector<14x32xbf16>
    %258 = tpu.concatenate %257, %254 in 0 : vector<14x32xbf16>, vector<2x32xbf16> -> vector<16x32xbf16>
    %c1_136 = arith.constant 1 : index
    %c0_137 = arith.constant 0 : index
    %c0_138 = arith.constant 0 : index
    %c0_139 = arith.constant 0 : index
    %259 = vector.load %arg6[%c1_136, %c0_137, %c0_138, %c0_139] : memref<2x3x32x32xbf16, #tpu.memory_space<vmem>>, vector<1x1x32x32xbf16>
    %260 = vector.shape_cast %259 : vector<1x1x32x32xbf16> to vector<32x32xbf16>
    %cst_140 = arith.constant dense<0.000000e+00> : vector<16x32xf32>
    %261 = tpu.matmul %256, %260, %cst_140 {dimension_numbers = #tpu.dot_dimension_numbers<[1], [0], [0], [1], [0, 0, 1, 1], [], []>} : vector<16x32xbf16>, vector<32x32xbf16>, vector<16x32xf32> -> vector<16x32xf32>
    %262 = arith.addf %253, %261 : vector<16x32xf32>
    %c1_141 = arith.constant 1 : index
    %c2_142 = arith.constant 2 : index
    %c0_143 = arith.constant 0 : index
    %c0_144 = arith.constant 0 : index
    %263 = vector.load %arg6[%c1_141, %c2_142, %c0_143, %c0_144] : memref<2x3x32x32xbf16, #tpu.memory_space<vmem>>, vector<1x1x32x32xbf16>
    %264 = vector.shape_cast %263 : vector<1x1x32x32xbf16> to vector<32x32xbf16>
    %cst_145 = arith.constant dense<0.000000e+00> : vector<16x32xf32>
    %265 = tpu.matmul %258, %264, %cst_145 {dimension_numbers = #tpu.dot_dimension_numbers<[1], [0], [0], [1], [0, 0, 1, 1], [], []>} : vector<16x32xbf16>, vector<32x32xbf16>, vector<16x32xf32> -> vector<16x32xf32>
    %266 = arith.addf %262, %265 : vector<16x32xf32>
    %267 = vector.broadcast %250 : vector<1x32xf32> to vector<16x32xf32>
    %268 = arith.addf %266, %267 : vector<16x32xf32>
    %269 = arith.addf %268, %146 : vector<16x32xf32>
    %270 = arith.truncf %269 : vector<16x32xf32> to vector<16x32xbf16>
    %c0_146 = arith.constant 0 : index
    %c0_147 = arith.constant 0 : index
    %271 = vector.load %arg12[%c0_146, %c0_147] : memref<32x128xbf16, #tpu.memory_space<vmem>>, vector<32x128xbf16>
    %cst_148 = arith.constant dense<0.000000e+00> : vector<16x128xf32>
    %272 = tpu.matmul %270, %271, %cst_148 {dimension_numbers = #tpu.dot_dimension_numbers<[1], [0], [0], [1], [0, 0, 1, 1], [], []>} : vector<16x32xbf16>, vector<32x128xbf16>, vector<16x128xf32> -> vector<16x128xf32>
    %c0_149 = arith.constant 0 : index
    %c0_150 = arith.constant 0 : index
    %273 = vector.load %arg13[%c0_149, %c0_150] : memref<1x128xf32, #tpu.memory_space<vmem>>, vector<1x128xf32>
    %274 = vector.broadcast %273 : vector<1x128xf32> to vector<16x128xf32>
    %275 = arith.addf %272, %274 : vector<16x128xf32>
    %cst_151 = arith.constant 5.000000e-01 : f32
    %276 = vector.broadcast %cst_151 : f32 to vector<16x32xf32>
    %277 = arith.mulf %276, %269 : vector<16x32xf32>
    %cst_152 = arith.constant 0.707106769 : f32
    %278 = vector.broadcast %cst_152 : f32 to vector<16x32xf32>
    %279 = arith.mulf %269, %278 : vector<16x32xf32>
    %280 = math.absf %279 : vector<16x32xf32>
    %cst_153 = arith.constant 0.327591091 : f32
    %281 = vector.broadcast %cst_153 : f32 to vector<16x32xf32>
    %282 = arith.mulf %281, %280 : vector<16x32xf32>
    %cst_154 = arith.constant 1.000000e+00 : f32
    %283 = vector.broadcast %cst_154 : f32 to vector<16x32xf32>
    %284 = arith.addf %283, %282 : vector<16x32xf32>
    %cst_155 = arith.constant 1.000000e+00 : f32
    %285 = vector.broadcast %cst_155 : f32 to vector<16x32xf32>
    %286 = arith.divf %285, %284 : vector<16x32xf32>
    %cst_156 = arith.constant 1.06140542 : f32
    %287 = vector.broadcast %cst_156 : f32 to vector<16x32xf32>
    %288 = arith.mulf %287, %286 : vector<16x32xf32>
    %cst_157 = arith.constant -1.45315206 : f32
    %289 = vector.broadcast %cst_157 : f32 to vector<16x32xf32>
    %290 = arith.addf %288, %289 : vector<16x32xf32>
    %291 = arith.mulf %290, %286 : vector<16x32xf32>
    %cst_158 = arith.constant 1.42141378 : f32
    %292 = vector.broadcast %cst_158 : f32 to vector<16x32xf32>
    %293 = arith.addf %291, %292 : vector<16x32xf32>
    %294 = arith.mulf %293, %286 : vector<16x32xf32>
    %cst_159 = arith.constant -0.284496725 : f32
    %295 = vector.broadcast %cst_159 : f32 to vector<16x32xf32>
    %296 = arith.addf %294, %295 : vector<16x32xf32>
    %297 = arith.mulf %296, %286 : vector<16x32xf32>
    %cst_160 = arith.constant 0.254829586 : f32
    %298 = vector.broadcast %cst_160 : f32 to vector<16x32xf32>
    %299 = arith.addf %297, %298 : vector<16x32xf32>
    %300 = arith.mulf %299, %286 : vector<16x32xf32>
    %301 = arith.mulf %280, %280 : vector<16x32xf32>
    %cst_161 = arith.constant 0.000000e+00 : f32
    %302 = vector.broadcast %cst_161 : f32 to vector<16x32xf32>
    %303 = arith.subf %302, %301 : vector<16x32xf32>
    %304 = math.exp %303 : vector<16x32xf32>
    %305 = arith.mulf %300, %304 : vector<16x32xf32>
    %cst_162 = arith.constant 1.000000e+00 : f32
    %306 = vector.broadcast %cst_162 : f32 to vector<16x32xf32>
    %307 = arith.subf %306, %305 : vector<16x32xf32>
    %cst_163 = arith.constant 0.000000e+00 : f32
    %308 = vector.broadcast %cst_163 : f32 to vector<16x32xf32>
    %309 = arith.cmpf olt, %279, %308 : vector<16x32xf32>
    %cst_164 = arith.constant 0.000000e+00 : f32
    %310 = vector.broadcast %cst_164 : f32 to vector<16x32xf32>
    %311 = arith.subf %310, %307 : vector<16x32xf32>
    %312 = arith.select %309, %311, %307 : vector<16x32xi1>, vector<16x32xf32>
    %cst_165 = arith.constant 1.000000e+00 : f32
    %313 = vector.broadcast %cst_165 : f32 to vector<16x32xf32>
    %314 = arith.addf %313, %312 : vector<16x32xf32>
    %315 = arith.mulf %277, %314 : vector<16x32xf32>
    %316 = arith.truncf %315 : vector<16x32xf32> to vector<16x32xbf16>
    %c0_166 = arith.constant 0 : index
    %c0_167 = arith.constant 0 : index
    %317 = vector.load %arg9[%c0_166, %c0_167] : memref<1x128xf32, #tpu.memory_space<vmem>>, vector<1x128xf32>
    %c1_168 = arith.constant 1 : index
    %c0_169 = arith.constant 0 : index
    %c0_170 = arith.constant 0 : index
    %318 = vector.load %arg8[%c1_168, %c0_169, %c0_170] : memref<3x32x128xbf16, #tpu.memory_space<vmem>>, vector<1x32x128xbf16>
    %319 = vector.shape_cast %318 : vector<1x32x128xbf16> to vector<32x128xbf16>
    %cst_171 = arith.constant dense<0.000000e+00> : vector<16x128xf32>
    %320 = tpu.matmul %316, %319, %cst_171 {dimension_numbers = #tpu.dot_dimension_numbers<[1], [0], [0], [1], [0, 0, 1, 1], [], []>} : vector<16x32xbf16>, vector<32x128xbf16>, vector<16x128xf32> -> vector<16x128xf32>
    %cst_172 = arith.constant 0.000000e+00 : bf16
    %321 = vector.broadcast %cst_172 : bf16 to vector<4x32xbf16>
    %322 = vector.extract_strided_slice %316 {offsets = [0, 0], sizes = [12, 32], strides = [1, 1]} : vector<16x32xbf16> to vector<12x32xbf16>
    %323 = tpu.concatenate %321, %322 in 0 : vector<4x32xbf16>, vector<12x32xbf16> -> vector<16x32xbf16>
    %324 = vector.extract_strided_slice %316 {offsets = [4, 0], sizes = [12, 32], strides = [1, 1]} : vector<16x32xbf16> to vector<12x32xbf16>
    %325 = tpu.concatenate %324, %321 in 0 : vector<12x32xbf16>, vector<4x32xbf16> -> vector<16x32xbf16>
    %c0_173 = arith.constant 0 : index
    %c0_174 = arith.constant 0 : index
    %c0_175 = arith.constant 0 : index
    %326 = vector.load %arg8[%c0_173, %c0_174, %c0_175] : memref<3x32x128xbf16, #tpu.memory_space<vmem>>, vector<1x32x128xbf16>
    %327 = vector.shape_cast %326 : vector<1x32x128xbf16> to vector<32x128xbf16>
    %cst_176 = arith.constant dense<0.000000e+00> : vector<16x128xf32>
    %328 = tpu.matmul %323, %327, %cst_176 {dimension_numbers = #tpu.dot_dimension_numbers<[1], [0], [0], [1], [0, 0, 1, 1], [], []>} : vector<16x32xbf16>, vector<32x128xbf16>, vector<16x128xf32> -> vector<16x128xf32>
    %329 = arith.addf %320, %328 : vector<16x128xf32>
    %c2_177 = arith.constant 2 : index
    %c0_178 = arith.constant 0 : index
    %c0_179 = arith.constant 0 : index
    %330 = vector.load %arg8[%c2_177, %c0_178, %c0_179] : memref<3x32x128xbf16, #tpu.memory_space<vmem>>, vector<1x32x128xbf16>
    %331 = vector.shape_cast %330 : vector<1x32x128xbf16> to vector<32x128xbf16>
    %cst_180 = arith.constant dense<0.000000e+00> : vector<16x128xf32>
    %332 = tpu.matmul %325, %331, %cst_180 {dimension_numbers = #tpu.dot_dimension_numbers<[1], [0], [0], [1], [0, 0, 1, 1], [], []>} : vector<16x32xbf16>, vector<32x128xbf16>, vector<16x128xf32> -> vector<16x128xf32>
    %333 = arith.addf %329, %332 : vector<16x128xf32>
    %334 = vector.broadcast %317 : vector<1x128xf32> to vector<16x128xf32>
    %335 = arith.addf %333, %334 : vector<16x128xf32>
    %cst_181 = arith.constant 5.000000e-01 : f32
    %336 = vector.broadcast %cst_181 : f32 to vector<16x128xf32>
    %337 = arith.mulf %336, %335 : vector<16x128xf32>
    %cst_182 = arith.constant 0.707106769 : f32
    %338 = vector.broadcast %cst_182 : f32 to vector<16x128xf32>
    %339 = arith.mulf %335, %338 : vector<16x128xf32>
    %340 = math.absf %339 : vector<16x128xf32>
    %cst_183 = arith.constant 0.327591091 : f32
    %341 = vector.broadcast %cst_183 : f32 to vector<16x128xf32>
    %342 = arith.mulf %341, %340 : vector<16x128xf32>
    %cst_184 = arith.constant 1.000000e+00 : f32
    %343 = vector.broadcast %cst_184 : f32 to vector<16x128xf32>
    %344 = arith.addf %343, %342 : vector<16x128xf32>
    %cst_185 = arith.constant 1.000000e+00 : f32
    %345 = vector.broadcast %cst_185 : f32 to vector<16x128xf32>
    %346 = arith.divf %345, %344 : vector<16x128xf32>
    %cst_186 = arith.constant 1.06140542 : f32
    %347 = vector.broadcast %cst_186 : f32 to vector<16x128xf32>
    %348 = arith.mulf %347, %346 : vector<16x128xf32>
    %cst_187 = arith.constant -1.45315206 : f32
    %349 = vector.broadcast %cst_187 : f32 to vector<16x128xf32>
    %350 = arith.addf %348, %349 : vector<16x128xf32>
    %351 = arith.mulf %350, %346 : vector<16x128xf32>
    %cst_188 = arith.constant 1.42141378 : f32
    %352 = vector.broadcast %cst_188 : f32 to vector<16x128xf32>
    %353 = arith.addf %351, %352 : vector<16x128xf32>
    %354 = arith.mulf %353, %346 : vector<16x128xf32>
    %cst_189 = arith.constant -0.284496725 : f32
    %355 = vector.broadcast %cst_189 : f32 to vector<16x128xf32>
    %356 = arith.addf %354, %355 : vector<16x128xf32>
    %357 = arith.mulf %356, %346 : vector<16x128xf32>
    %cst_190 = arith.constant 0.254829586 : f32
    %358 = vector.broadcast %cst_190 : f32 to vector<16x128xf32>
    %359 = arith.addf %357, %358 : vector<16x128xf32>
    %360 = arith.mulf %359, %346 : vector<16x128xf32>
    %361 = arith.mulf %340, %340 : vector<16x128xf32>
    %cst_191 = arith.constant 0.000000e+00 : f32
    %362 = vector.broadcast %cst_191 : f32 to vector<16x128xf32>
    %363 = arith.subf %362, %361 : vector<16x128xf32>
    %364 = math.exp %363 : vector<16x128xf32>
    %365 = arith.mulf %360, %364 : vector<16x128xf32>
    %cst_192 = arith.constant 1.000000e+00 : f32
    %366 = vector.broadcast %cst_192 : f32 to vector<16x128xf32>
    %367 = arith.subf %366, %365 : vector<16x128xf32>
    %cst_193 = arith.constant 0.000000e+00 : f32
    %368 = vector.broadcast %cst_193 : f32 to vector<16x128xf32>
    %369 = arith.cmpf olt, %339, %368 : vector<16x128xf32>
    %cst_194 = arith.constant 0.000000e+00 : f32
    %370 = vector.broadcast %cst_194 : f32 to vector<16x128xf32>
    %371 = arith.subf %370, %367 : vector<16x128xf32>
    %372 = arith.select %369, %371, %367 : vector<16x128xi1>, vector<16x128xf32>
    %cst_195 = arith.constant 1.000000e+00 : f32
    %373 = vector.broadcast %cst_195 : f32 to vector<16x128xf32>
    %374 = arith.addf %373, %372 : vector<16x128xf32>
    %375 = arith.mulf %337, %374 : vector<16x128xf32>
    %376 = arith.truncf %375 : vector<16x128xf32> to vector<16x128xbf16>
    %c0_196 = arith.constant 0 : index
    %c0_197 = arith.constant 0 : index
    %377 = vector.load %arg11[%c0_196, %c0_197] : memref<1x128xf32, #tpu.memory_space<vmem>>, vector<1x128xf32>
    %c1_198 = arith.constant 1 : index
    %c0_199 = arith.constant 0 : index
    %c0_200 = arith.constant 0 : index
    %378 = vector.load %arg10[%c1_198, %c0_199, %c0_200] : memref<3x128x128xbf16, #tpu.memory_space<vmem>>, vector<1x128x128xbf16>
    %379 = vector.shape_cast %378 : vector<1x128x128xbf16> to vector<128x128xbf16>
    %cst_201 = arith.constant dense<0.000000e+00> : vector<16x128xf32>
    %380 = tpu.matmul %376, %379, %cst_201 {dimension_numbers = #tpu.dot_dimension_numbers<[1], [0], [0], [1], [0, 0, 1, 1], [], []>} : vector<16x128xbf16>, vector<128x128xbf16>, vector<16x128xf32> -> vector<16x128xf32>
    %cst_202 = arith.constant 0.000000e+00 : bf16
    %381 = vector.broadcast %cst_202 : bf16 to vector<4x128xbf16>
    %382 = vector.extract_strided_slice %376 {offsets = [0, 0], sizes = [12, 128], strides = [1, 1]} : vector<16x128xbf16> to vector<12x128xbf16>
    %383 = tpu.concatenate %381, %382 in 0 : vector<4x128xbf16>, vector<12x128xbf16> -> vector<16x128xbf16>
    %384 = vector.extract_strided_slice %376 {offsets = [4, 0], sizes = [12, 128], strides = [1, 1]} : vector<16x128xbf16> to vector<12x128xbf16>
    %385 = tpu.concatenate %384, %381 in 0 : vector<12x128xbf16>, vector<4x128xbf16> -> vector<16x128xbf16>
    %c0_203 = arith.constant 0 : index
    %c0_204 = arith.constant 0 : index
    %c0_205 = arith.constant 0 : index
    %386 = vector.load %arg10[%c0_203, %c0_204, %c0_205] : memref<3x128x128xbf16, #tpu.memory_space<vmem>>, vector<1x128x128xbf16>
    %387 = vector.shape_cast %386 : vector<1x128x128xbf16> to vector<128x128xbf16>
    %cst_206 = arith.constant dense<0.000000e+00> : vector<16x128xf32>
    %388 = tpu.matmul %383, %387, %cst_206 {dimension_numbers = #tpu.dot_dimension_numbers<[1], [0], [0], [1], [0, 0, 1, 1], [], []>} : vector<16x128xbf16>, vector<128x128xbf16>, vector<16x128xf32> -> vector<16x128xf32>
    %389 = arith.addf %380, %388 : vector<16x128xf32>
    %c2_207 = arith.constant 2 : index
    %c0_208 = arith.constant 0 : index
    %c0_209 = arith.constant 0 : index
    %390 = vector.load %arg10[%c2_207, %c0_208, %c0_209] : memref<3x128x128xbf16, #tpu.memory_space<vmem>>, vector<1x128x128xbf16>
    %391 = vector.shape_cast %390 : vector<1x128x128xbf16> to vector<128x128xbf16>
    %cst_210 = arith.constant dense<0.000000e+00> : vector<16x128xf32>
    %392 = tpu.matmul %385, %391, %cst_210 {dimension_numbers = #tpu.dot_dimension_numbers<[1], [0], [0], [1], [0, 0, 1, 1], [], []>} : vector<16x128xbf16>, vector<128x128xbf16>, vector<16x128xf32> -> vector<16x128xf32>
    %393 = arith.addf %389, %392 : vector<16x128xf32>
    %394 = vector.broadcast %377 : vector<1x128xf32> to vector<16x128xf32>
    %395 = arith.addf %393, %394 : vector<16x128xf32>
    %396 = arith.addf %395, %275 : vector<16x128xf32>
    %c0_211 = arith.constant 0 : index
    %c0_212 = arith.constant 0 : index
    %c0_213 = arith.constant 0 : index
    %397 = vector.load %arg14[%c0_211, %c0_212, %c0_213] : memref<1x16x128xf32, #tpu.memory_space<vmem>>, vector<1x16x128xf32>
    %398 = vector.shape_cast %397 : vector<1x16x128xf32> to vector<16x128xf32>
    %399 = vector.shape_cast %396 : vector<16x128xf32> to vector<1x16x128xf32>
    tpu.vector_store %arg14[%c0_211, %c0_212, %c0_213], %399 {strides = array<i32>} : memref<1x16x128xf32, #tpu.memory_space<vmem>>, vector<1x16x128xf32>,
    return
  }
  func.func @transform_0(%arg0: i32) -> (i32, i32, i32) {
    %c0_i32 = arith.constant 0 : i32
    %c0_i32_0 = arith.constant 0 : i32
    %c0_i32_1 = arith.constant 0 : i32
    return %arg0, %c0_i32, %c0_i32_0 : i32, i32, i32
  }
  func.func @transform_1(%arg0: i32) -> (i32, i32) {
    %c0_i32 = arith.constant 0 : i32
    %c0_i32_0 = arith.constant 0 : i32
    %c0_i32_1 = arith.constant 0 : i32
    return %c0_i32, %c0_i32_0 : i32, i32
  }
  func.func @transform_2(%arg0: i32) -> (i32, i32) {
    %c0_i32 = arith.constant 0 : i32
    %c0_i32_0 = arith.constant 0 : i32
    %c0_i32_1 = arith.constant 0 : i32
    return %c0_i32, %c0_i32_0 : i32, i32
  }
  func.func @transform_3(%arg0: i32) -> (i32, i32, i32, i32) {
    %c0_i32 = arith.constant 0 : i32
    %c0_i32_0 = arith.constant 0 : i32
    %c0_i32_1 = arith.constant 0 : i32
    %c0_i32_2 = arith.constant 0 : i32
    %c0_i32_3 = arith.constant 0 : i32
    return %c0_i32, %c0_i32_0, %c0_i32_1, %c0_i32_2 : i32, i32, i32, i32
  }
  func.func @transform_4(%arg0: i32) -> (i32, i32, i32) {
    %c0_i32 = arith.constant 0 : i32
    %c0_i32_0 = arith.constant 0 : i32
    %c0_i32_1 = arith.constant 0 : i32
    %c0_i32_2 = arith.constant 0 : i32
    return %c0_i32, %c0_i32_0, %c0_i32_1 : i32, i32, i32
  }
  func.func @transform_5(%arg0: i32) -> (i32, i32, i32, i32) {
    %c0_i32 = arith.constant 0 : i32
    %c0_i32_0 = arith.constant 0 : i32
    %c0_i32_1 = arith.constant 0 : i32
    %c0_i32_2 = arith.constant 0 : i32
    %c0_i32_3 = arith.constant 0 : i32
    return %c0_i32, %c0_i32_0, %c0_i32_1, %c0_i32_2 : i32, i32, i32, i32
  }
  func.func @transform_6(%arg0: i32) -> (i32, i32, i32) {
    %c0_i32 = arith.constant 0 : i32
    %c0_i32_0 = arith.constant 0 : i32
    %c0_i32_1 = arith.constant 0 : i32
    %c0_i32_2 = arith.constant 0 : i32
    return %c0_i32, %c0_i32_0, %c0_i32_1 : i32, i32, i32
  }
  func.func @transform_7(%arg0: i32) -> (i32, i32, i32) {
    %c0_i32 = arith.constant 0 : i32
    %c0_i32_0 = arith.constant 0 : i32
    %c0_i32_1 = arith.constant 0 : i32
    %c0_i32_2 = arith.constant 0 : i32
    return %c0_i32, %c0_i32_0, %c0_i32_1 : i32, i32, i32
  }
  func.func @transform_8(%arg0: i32) -> (i32, i32) {
    %c0_i32 = arith.constant 0 : i32
    %c0_i32_0 = arith.constant 0 : i32
    %c0_i32_1 = arith.constant 0 : i32
    return %c0_i32, %c0_i32_0 : i32, i32
  }
  func.func @transform_9(%arg0: i32) -> (i32, i32, i32) {
    %c0_i32 = arith.constant 0 : i32
    %c0_i32_0 = arith.constant 0 : i32
    %c0_i32_1 = arith.constant 0 : i32
    %c0_i32_2 = arith.constant 0 : i32
    return %c0_i32, %c0_i32_0, %c0_i32_1 : i32, i32, i32
  }
  func.func @transform_10(%arg0: i32) -> (i32, i32) {
    %c0_i32 = arith.constant 0 : i32
    %c0_i32_0 = arith.constant 0 : i32
    %c0_i32_1 = arith.constant 0 : i32
    return %c0_i32, %c0_i32_0 : i32, i32
  }
  func.func @transform_11(%arg0: i32) -> (i32, i32) {
    %c0_i32 = arith.constant 0 : i32
    %c0_i32_0 = arith.constant 0 : i32
    %c0_i32_1 = arith.constant 0 : i32
    return %c0_i32, %c0_i32_0 : i32, i32
  }
  func.func @transform_12(%arg0: i32) -> (i32, i32) {
    %c0_i32 = arith.constant 0 : i32
    %c0_i32_0 = arith.constant 0 : i32
    %c0_i32_1 = arith.constant 0 : i32
    return %c0_i32, %c0_i32_0 : i32, i32
  }
  func.func @transform_13(%arg0: i32) -> (i32, i32, i32) {
    %c0_i32 = arith.constant 0 : i32
    %c0_i32_0 = arith.constant 0 : i32
    %c0_i32_1 = arith.constant 0 : i32
    return %arg0, %c0_i32, %c0_i32_0 : i32, i32, i32
  }
}

</mosaic_0001>

<bundles_post_ra>
// kernel: tpu_custom_call.1
= control target key start
LH: loop header
LB: loop body
LE: loop exit
PB: predicated region body
PF: predicated region fallthrough
CT: control target
= control target key end

     0   :  { %18 = vsyncpa [#allocation3], 0  ;;  %s3833_s0 = inlined_call_operand.vmem [shape: f32[2,16,4], index: 0, kind: input, shape index: {}]   ;;  %s3834_s1 = inlined_call_operand.vmem [shape: bf16[4,32], index: 1, kind: input, shape index: {}]   ;;  %s3835_s2 = inlined_call_operand.hbm [shape: f32[1,32], index: 2, kind: input, shape index: {}]   ;;  %s3836_s3 = inlined_call_operand.hbm [shape: bf16[2,3,32,32], index: 3, kind: input, shape index: {}]   ;;  %s3837_s4 = inlined_call_operand.vmem [shape: f32[2,1,32], index: 4, kind: input, shape index: {}]   ;;  %s3838_s5 = inlined_call_operand.hbm [shape: bf16[2,3,32,32], index: 5, kind: input, shape index: {}]   ;;  %s3839_s6 = inlined_call_operand.hbm [shape: f32[2,1,32], index: 6, kind: input, shape index: {}]   ;;  %s3840_s7 = inlined_call_operand.vmem [shape: bf16[3,32,128], index: 7, kind: input, shape index: {}]   ;;  %s3841_s8 = inlined_call_operand.vmem [shape: f32[1,128], index: 8, kind: input, shape index: {}]   ;;  %s3842_s9 = inlined_call_operand.hbm [shape: bf16[3,128,128], index: 9, kind: input, shape index: {}]   ;;  %s3843_s10 = inlined_call_operand.vmem [shape: f32[1,128], index: 10, kind: input, shape index: {}]   ;;  %s3844_s11 = inlined_call_operand.hbm [shape: bf16[32,128], index: 11, kind: input, shape index: {}]   ;;  %s3845_s12 = inlined_call_operand.vmem [shape: f32[1,128], index: 12, kind: input, shape index: {}]   ;;  %s3846_s13 = inlined_call_operand.hbm [shape: f32[2,16,128], index: 13, kind: output, shape index: {}]  }
   0x1   :  { %19 = vsyncpa [#allocation6], 0 }
   0x2   :  { %20 = vsyncpa [#allocation9], 0 }
   0x3   :  { %21 = vsyncpa [#allocation12], 0 }
   0x4   :  { %22 = vsyncpa [#allocation4], 0 }
   0x5   :  { %24 = vsyncpa [#allocation4 + $0x1], 0  ;;  %s3425_s25 = smov 0   ;;  %s3427_s26 = smov 0  }
   0x6   :  { %s3429_s27 = smov 0   ;;  %s3431_s28 = smov 0  }
   0x7 LB: > { %3860 = sst [smem:[#allocation19_spill]] %s3326_s25  ;;  %s3446_s29 = sadd.s32 4294967295, %s3338_s28   ;;  %s3338_s28 = sphi %s3431_s28, %s3891_s28   ;;  %s3334_s27 = sphi %s3429_s27, %s3893_s27   ;;  %s3330_s26 = sphi %s3427_s26, %s3895_s26   ;;  %s3326_s25 = sphi %s3425_s25, %s3894_s25  }
   0x8   : > { %3861 = sst [smem:[#allocation20_spill]] %s3334_s27  ;;  %s2504_s30 = sadd.s32 4294967294, %s3338_s28  }
   0x9   : > { %3862 = sst [smem:[#allocation21_spill]] %s3338_s28  ;;  %s3450_s14 = sadd.s32 1, %s3338_s28  }
   0xa   : > { %3863 = sst [smem:[#allocation22_spill]] %s3450_s14  ;;  %s315_s15 = sadd.s32 1, %s3334_s27 }
   0xb   : > { %s312_s16 = ssub.s32 %s3338_s28, %s3450_s14  ;;  %p325_p0 = scmp.ne.s32.totalorder %s3334_s27, %s3330_s26 }
   0xc   : > { %p313_p1 = scmp.eq.s32.totalorder %s312_s16, 0  ;;  %p326_p2 = scmp.eq.s32.totalorder %s3446_s29, 1 }
   0xd   : > { %p331_p3 = scmp.ne.s32.totalorder %s3330_s26, %s3326_s25  ;;  %p332_p4 = scmp.eq.s32.totalorder %s2504_s30, 1 }
   0xe   : > { %s3461_s17 = scalar_select %p313_p1, %s3334_s27, %s315_s15  }
   0xf   : > { %p3463_p5 = por %p326_p2, %p325_p0  ;;  %p3467_p6 = por %p332_p4, %p331_p3 }
  0x10   : > { %3864 = sst [smem:[#allocation23_spill]] %s3461_s17  ;;  %p2505_p7 = scmp.ge.s32.totalorder %s3338_s28, 1 }
  0x11   : > { %s3865_s18 = scalar_select %p3463_p5, 1, 0 }
  0x12   : > { %s3866_s19 = scalar_select %p3467_p6, 1, 0 }
  0x13   : > { %p339_p8 = scmp.lt.s32.totalorder %s3338_s28, 3  ;;  %p3857_p9 = scmp.eq.s32.totalorder %s3446_s29, 0 }
  0x14   : > { %3867 = sst [smem:[#allocation24_spill]] %s3866_s19  ;;  %s3340_s21 = smov [#allocation5]  }
  0x15   : > { %p3474_p10 = pnand %p2505_p7, %p339_p8  ;;  %s365_s22 = sshll.u32 %s3340_s21, 4  ;;  %s366_s22 = int_to_ptr.vmem [resolvable:$true] %s365_s22 }
  0x16   : > { %s3341_s24 = smov [#allocation8]   ;;  %s3117_s16 = scalar_lea.vmem %s366_s22, 1536 }
  0x17   : > { %s3868_s20 = scalar_select %p3474_p10, 1, 0 }
  0x18   : > { %p2920_p11 = pneg %p3474_p10  ;;  %s394_s30 = sshll.u32 %s3341_s24, 4  ;;  %s395_s30 = int_to_ptr.vmem [resolvable:$true] %s394_s30 }
  0x19   : > { %p3118_p0 = scmp.ne.s32.totalorder %s366_s22, %s3117_s16  ;;  %p3125_p3 = scmp.lt.s32.totalorder %s366_s22, %s366_s22 }
  0x1a   : > { %p3482_p12 = pnand %p3857_p9, %p2920_p11  ;;  %p3126_p4 = scmp.lt.s32.totalorder %s3117_s16, %s3117_s16 }
  0x1c   : > { %p3488_p13 = pneg %p3482_p12  ;;  %p3127_p7 = por %p3126_p4, %p3125_p3 }
  0x1e   : > { %p3120_p1 = pnand %p3118_p0, %p3488_p13 }
  0x20   : > { %p3121_p2 = pneg %p3120_p1 }
  0x22   : > { %p3128_p8 = pnand %p3127_p7, %p3121_p2 }
  0x24   : > { %3131 = shalt.err (!%p3128_p8)
}
  0x25   : > { %s3853_s21 = smov 64   ;;  %s3855_s24 = smov 4  }
  0x26   : > { %2926 = dma.hbm_to_vmem [thread:$0]  (!%p3482_p12), %s3836_s3, 1536, %s366_s22, [#allocation6], %s3853_s21, %s3853_s21, %s3855_s24  }
  0x27   : > { %s3143_s14 = scalar_lea.vmem %s395_s30, 32  ;;  %p3151_p3 = scmp.lt.s32.totalorder %s395_s30, %s395_s30 }
  0x28   : > { %p3144_p11 = scmp.ne.s32.totalorder %s395_s30, %s3143_s14  ;;  %p3152_p2 = scmp.lt.s32.totalorder %s3143_s14, %s3143_s14 }
  0x2a   : > { %p3146_p0 = pnand %p3144_p11, %p3488_p13  ;;  %p3153_p4 = por %p3152_p2, %p3151_p3 }
  0x2c   : > { %p3147_p1 = pneg %p3146_p0 }
  0x2e   : > { %p3154_p7 = pnand %p3153_p4, %p3147_p1 }
  0x30   : > { %3157 = shalt.err (!%p3154_p7)
}
  0x31   : > { %s3344_s16 = smov 16   ;;  %s3345_s19 = smov 1  }
  0x32   : > { %2932 = dma.hbm_to_vmem [thread:$0]  (!%p3482_p12), %s3839_s6, 32, %s395_s30, [#allocation9], %s3344_s16, %s3344_s16, %s3345_s19  }
  0x33   : > { %s3346_s27 = smov [#allocation2]   ;;  %s3347_s22 = smov [#allocation7]  }
  0x34   : > { %s355_s17 = sshll.u32 %s3346_s27, 4  ;;  %s381_s21 = sshll.u32 %s3347_s22, 4  ;;  %s356_s17 = int_to_ptr.vmem [resolvable:$true] %s355_s17  ;;  %s382_s21 = int_to_ptr.vmem [resolvable:$true] %s381_s21 }
  0x35   : > { %s3169_s24 = scalar_lea.vmem %s356_s17, 16  ;;  %s3176_s14 = scalar_lea.vmem %s356_s17, 32 }
  0x36   : > { %p3170_p8 = scmp.ne.s32.totalorder %s356_s17, %s3169_s24  ;;  %p3177_p1 = scmp.lt.s32.totalorder %s356_s17, %s356_s17 }
  0x37   : > { %p3178_p3 = scmp.lt.s32.totalorder %s3176_s14, %s3169_s24 }
  0x38   : > { %p3172_p11 = pnand %p3170_p8, %p3488_p13 }
  0x39   : > { %p3179_p2 = por %p3178_p3, %p3177_p1 }
  0x3a   : > { %p3173_p0 = pneg %p3172_p11 }
  0x3c   : > { %p3180_p4 = pnand %p3179_p2, %p3173_p0 }
  0x3e   : > { %3183 = shalt.err (!%p3180_p4)
}
  0x3f   : > { %2923 = dma.hbm_to_vmem [thread:$0]  (!%p3482_p12), %s3835_s2, 16, %s356_s17, [#allocation3]  }
  0x40   : > { %s3195_s19 = scalar_lea.vmem %s382_s21, 1536  ;;  %p3203_p8 = scmp.lt.s32.totalorder %s382_s21, %s382_s21 }
  0x41   : > { %p3196_p7 = scmp.ne.s32.totalorder %s382_s21, %s3195_s19  ;;  %p3204_p11 = scmp.lt.s32.totalorder %s3195_s19, %s3195_s19 }
  0x43   : > { %p3198_p9 = pnand %p3196_p7, %p3488_p13  ;;  %p3205_p5 = por %p3204_p11, %p3203_p8 }
  0x45   : > { %p3199_p6 = pneg %p3198_p9 }
  0x47   : > { %p3206_p10 = pnand %p3205_p5, %p3199_p6 }
  0x49   : > { %3209 = shalt.err (!%p3206_p10)
}
  0x4a   : > { %s3871_s30 = smov 4   ;;  %s3872_s24 = smov 64  }
  0x4b   : > { %2929 = dma.hbm_to_vmem [thread:$0]  (!%p3482_p12), %s3838_s5, 1536, %s382_s21, [#allocation6], %s3872_s24, %s3872_s24, %s3871_s30  }
  0x4c   : > { %s3348_s17 = smov [#allocation10]   ;;  %s3349_s14 = smov [#allocation11]  }
  0x4d   : > { %s413_s22 = sshll.u32 %s3348_s17, 4  ;;  %s429_s25 = sshll.u32 %s3349_s14, 4  ;;  %s414_s22 = int_to_ptr.vmem [resolvable:$true] %s413_s22  ;;  %s430_s25 = int_to_ptr.vmem [resolvable:$true] %s429_s25 }
  0x4e   : > { %s3221_s28 = scalar_lea.vmem %s414_s22, 3072  ;;  %p3229_p10 = scmp.lt.s32.totalorder %s414_s22, %s414_s22 }
  0x4f   : > { %p3222_p9 = scmp.ne.s32.totalorder %s414_s22, %s3221_s28  ;;  %p3230_p0 = scmp.lt.s32.totalorder %s3221_s28, %s3221_s28 }
  0x51   : > { %p3224_p5 = pnand %p3222_p9, %p3488_p13  ;;  %p3231_p1 = por %p3230_p0, %p3229_p10 }
  0x53   : > { %p3225_p6 = pneg %p3224_p5 }
  0x55   : > { %p3232_p3 = pnand %p3231_p1, %p3225_p6 }
  0x57   : > { %3235 = shalt.err (!%p3232_p3)
}
  0x58   : > { %2935 = dma.hbm_to_vmem [thread:$0]  (!%p3482_p12), %s3842_s9, 3072, %s414_s22, [#allocation9], %s3872_s24, %s3872_s24, %s3871_s30  }
  0x59   : > { %s3247_s16 = scalar_lea.vmem %s430_s25, 256  ;;  %p3255_p8 = scmp.lt.s32.totalorder %s430_s25, %s430_s25 }
  0x5a   : > { %p3248_p2 = scmp.ne.s32.totalorder %s430_s25, %s3247_s16  ;;  %p3256_p11 = scmp.lt.s32.totalorder %s3247_s16, %s3247_s16 }
  0x5c   : > { %p3250_p4 = pnand %p3248_p2, %p3488_p13  ;;  %p3257_p9 = por %p3256_p11, %p3255_p8 }
  0x5e   : > { %p3251_p7 = pneg %p3250_p4 }
  0x60   : > { %p3258_p5 = pnand %p3257_p9, %p3251_p7 }
  0x62   : > { %3261 = shalt.err (!%p3258_p5)
}
  0x63   : > { %2938 = dma.hbm_to_vmem [thread:$0]  (!%p3482_p12), %s3844_s11, 256, %s430_s25, [#allocation12], %s3872_s24, %s3872_s24, %s3871_s30  }
  0x64   : > { %p3873_p6 = scmp.ne.s32.totalorder %s3868_s20, 0 }
  0x65   : > { %p3874_p13 = scmp.eq.s32.totalorder (!%p3873_p6), %s3446_s29, 0 }
  0x66   : > { %456 = sbr.rel (%p3873_p6) target bundleno = 2123 (0x84b), region = 72 }
  0x6b   : > { %3305 = dma.done.wait (%p3874_p13), [#allocation3], 16   ;;  %p3875_p10 = pmov %p3874_p13 }
  0x6d   : > { %3307 = vsyncadd (%p3875_p10), [#allocation3], 4294967280  ;;  %p3876_p0 = pmov %p3875_p10 }
  0x6f   : > { %3309 = dma.done.wait (%p3876_p0), [#allocation6], 3072   ;;  %p3877_p1 = pmov %p3876_p0 }
  0x70   : > { %p3878_p3 = pmov %p3876_p0 }
  0x71   : > { %3311 = vsyncadd (%p3877_p1), [#allocation6], 4294964224 }
  0x72   : > { %3313 = dma.done.wait (%p3878_p3), [#allocation9], 3104   ;;  %p3879_p12 = pmov %p3876_p0 }
  0x73   : > { %p3880_p2 = pmov %p3876_p0 }
  0x74   : > { %3315 = vsyncadd (%p3879_p12), [#allocation9], 4294964192 }
  0x75   : > { %3317 = dma.done.wait (%p3880_p2), [#allocation12], 256   ;;  %p3881_p4 = pmov %p3876_p0 }
  0x76   : > { %p520_p7 = scmp.lt.s32.totalorder %s3446_s29, 1  ;;  %v3350_v0 = vmov 0.0   ;;  %vm532_vm0 = vcmask 31744   ;;  %v548_v7 = vld [vmem:[%s3834_s1] sm:$0x3]  ;;  %vm559_vm3 = vcmask 1041408  }
  0x77   : > { %3319 = vsyncadd (%p3881_p4), [#allocation12], 4294967040  ;;  %2700 = vmatprep.subr.bf16.mxu0 %v3350_v0  ;;  %2738 = vmatprep.subr.bf16.mxu1 %v3350_v0  ;;  %v561_v8 = vsel %vm559_vm3, %v548_v7, 0  ;;  %vm3351_vm4 = vmmov 0   ;;  %v3002_v14 = vld [vmem:[#allocation5 + $0x8] sm:$0xff]   ;;  %v3003_v15 = vld [vmem:[#allocation5] sm:$0xff]  }
  0x78   : > { %s521_s20 = scalar_select %p520_p7, %s3446_s29, 1  ;;  %2701 = vmatpush3.bf16.msra.mxu0 %v561_v8  ;;  %2702 = vmatprep.mubr.msk.bf16.mxu0 %vm3351_vm4, %v3350_v0  ;;  %v2523_v16 = vld [vmem:[#allocation2] ss:$0 sm:$0xff]  ;;  %vm675_vm9 = vcmask 1040384   ;;  %vm676_vm10 = vsmask.f32 256 }
  0x79   : > { %2706 = vmatprep.subr.bf16.mxu0 %v3350_v0  ;;  %2742 = vmatprep.mubr.msk.bf16.mxu1 %vm3351_vm4, %v3350_v0  ;;  %vm3602_vm11 = vmand %vm675_vm9, %vm676_vm10  ;;  %vm702_vm12 = vcmask 261120   ;;  %vm682_vm13 = vcmask 1047552   ;;  %vm683_vm14 = vsmask.f32 7424  ;;  %s517_s16 = sand.u32 1, %s3330_s26   ;;  %s2622_s22 = sshll.u32 %s3446_s29, 8 }
  0x7a   : > { %s2621_s23 = sshll.u32 %s521_s20, 4  ;;  %vm3617_vm15 = vmand %vm682_vm13, %vm683_vm14  ;;  %s2520_s15 = sshll.u32 %s517_s16, 4 }
  0x7b   : > { %s524_s24 = scalar_lea.vmem %s3833_s0, %s2621_s23  ;;  %vm2596_vm14 = vmneg %vm559_vm3  ;;  %s519_s30 = scalar_lea.vmem [#allocation13], %s2520_s15 }
  0x7c   : > { %v526_v1 = vld [vmem:[%s524_s24] sm:$0xff]  ;;  %v527_v2 = vld [vmem:[%s524_s24 + $0x8] sm:$0xff]  ;;  %s2382_s24 = sshll.u32 %s519_s30, 4  ;;  %s3791_s28 = scalar_lea.hbm %s3846_s13, %s2622_s22  ;;  %s3786_s24 = int_to_ptr.vmem [resolvable:$true] %s2382_s24 }
  0x7d   : > { %vm528_vm1 = vcmp.ne.f32.partialorder %v526_v1, %v526_v1  ;;  %vm529_vm2 = vcmp.ne.f32.partialorder %v527_v2, %v527_v2  ;;  %s3793_s21 = scalar_lea.sflag [#allocation4], %s517_s16  ;;  %s3262_s29 = scalar_lea.vmem %s3786_s24, 256 }
  0x7e   : > { %v530_v3 = vsel %vm528_vm1, 1.0, %v3350_v0  ;;  %v531_v4 = vsel %vm529_vm2, 1.0, %v3350_v0  ;;  %p3263_p8 = scmp.ne.s32.totalorder %s3786_s24, %s3262_s29  ;;  %p3886_p11 = scmp.ne.s32.totalorder %s3865_s18, 0 }
  0x7f   : > { %v533_v5 = vsel %vm532_vm0, %v530_v3, -inf  ;;  %v536_v6 = vsel %vm532_vm0, %v531_v4, -inf  ;;  %s3352_s19 = smov [#allocation13]  }
  0x80   : > { %534 = vmax.xlane.f32.xlu0 %v533_v5  ;;  %p3264_p9 = pnand %p3263_p8, %p3886_p11  ;;  %s3266_s27 = sshll.u32 %s3352_s19, 4  ;;  %s3267_s27 = int_to_ptr.vmem [resolvable:$false] %s3266_s27 }
  0x81   : > { %s3268_s17 = scalar_lea.vmem %s3267_s27, 512  ;;  %p3269_p6 = scmp.lt.s32.totalorder %s3786_s24, %s3267_s27 }
  0x82   : > { %p3265_p5 = pneg %p3264_p9  ;;  %p3270_p13 = scmp.lt.s32.totalorder %s3268_s17, %s3262_s29 }
  0x84   : > { %537 = vmax.xlane.f32.xlu0 %v536_v6  ;;  %p3271_p10 = por %p3270_p13, %p3269_p6 }
  0x86   : > { %p3272_p0 = pnand %p3271_p10, %p3265_p5 }
 0x109   : > { %v535_v9 = vpop.xlane.xlu0 %534 }
 0x10a   : > { %vm539_vm5 = vcmp.lt.f32.partialorder %v535_v9, 0.5 }
 0x10b   : > { %v545_v11 = vsel %vm539_vm5, %v526_v1, 0.0 }
 0x10d   : > { %v538_v10 = vpop.xlane.xlu0 %537 }
 0x10e   : > { %vm540_vm6 = vcmp.lt.f32.partialorder %v538_v10, 0.5 }
 0x10f   : > { %v546_v12 = vsel %vm540_vm6, %v527_v2, 0.0 }
 0x110   : > { %v547_v13 = vpack.c.bf16 %v546_v12, %v545_v11 }
 0x112   : > { %2703 = vmatmul.mubr.msk.bf16.vlgmr.msra.gmra.mxu0 %vm532_vm0, %v547_v13 }
 0x113   : > { %2710 = vmatprep.mubr.msk.bf16.mxu0 %vm3351_vm4, %v3350_v0  ;;  %2707 = vmatpush3.bf16.msra.mxu0 %v3002_v14 }
 0x114   : > { %2708 = vmatprep.subr.bf16.mxu0 %v3350_v0 }
 0x117   : > { %2709 = vmatpush3.bf16.msra.mxu0 %v3003_v15 }
 0x118   : > { %2714 = vmatprep.subr.bf16.mxu0 %v3350_v0 }
 0x1d2   : > { %v597_v17 = vpop.f32.mrf.mxu0 }
 0x1d3   : > { %v598_v18 = vadd.f32 %v2523_v16, %v597_v17 }
 0x1d4   : > { %v2704_v19 = vpop.f32.mrf.mxu0 }
 0x1d5   : > { %v3592_v20 = vsel %vm539_vm5, %v598_v18, 0.0  ;;  %v3004_v18 = vld [vmem:[#allocation5 + $0x18] sm:$0xff]  }
 0x1d6   : > { %v608_v21 = vmul.f32 0.70710677, %v3592_v20  ;;  %v600_v22 = vpop.f32.mrf.mxu0  ;;  %v606_v7 = vmul.f32 0.5, %v3592_v20 }
 0x1d7   : > { %v601_v23 = vadd.f32 %v2523_v16, %v600_v22  ;;  %v3006_v22 = vld [vmem:[#allocation5 + $0x28] sm:$0xff]  }
 0x1d8   : > { %v610_v24 = vand.u32 2147483647, %v608_v21  ;;  %v2705_v25 = vpop.f32.mrf.mxu0  ;;  %vm650_vm7 = vcmp.lt.f32.partialorder %v608_v21, 0.0  ;;  %v3005_v21 = vld [vmem:[#allocation5 + $0x10] sm:$0xff]   ;;  %v3014_v16 = vld [vmem:[#allocation5 + $0x48] sm:$0xff]  }
 0x1d9   : > { %v3596_v26 = vsel %vm540_vm6, %v601_v23, 0.0  ;;  %vm1204_vm6 = vcmask 1046528  }
 0x1da   : > { %v612_v27 = vmul.f32 0.3275911, %v610_v24  ;;  %v609_v28 = vmul.f32 0.70710677, %v3596_v26  ;;  %v638_v33 = vmul.f32 %v610_v24, %v610_v24  ;;  %v607_v8 = vmul.f32 0.5, %v3596_v26  ;;  %v3007_v24 = vld [vmem:[#allocation5 + $0x20] sm:$0xff]  }
 0x1dc   : > { %v614_v29 = vadd.f32 1.0, %v612_v27  ;;  %v611_v30 = vand.u32 2147483647, %v609_v28  ;;  %v640_v34 = vsub.f32 0.0, %v638_v33  ;;  %vm651_vm8 = vcmp.lt.f32.partialorder %v609_v28, 0.0 }
 0x1de   : > { %3058 = vrcp.f32 %v614_v29  ;;  %v613_v31 = vmul.f32 0.3275911, %v611_v30  ;;  %v639_v35 = vmul.f32 %v611_v30, %v611_v30  ;;  %v642_v38 = vmul.f32 1.442695, %v640_v34  ;;  %v3008_v29 = vld [vmem:[#allocation7 + $0x18] sm:$0xff]   ;;  %v3009_v30 = vld [vmem:[#allocation7 + $0x10] sm:$0xff]  }
 0x1df   : > { %2739 = vmatpush3.bf16.msra.mxu1 %v3008_v29 }
 0x1e0   : > { %v615_v32 = vadd.f32 1.0, %v613_v31  ;;  %v641_v39 = vsub.f32 0.0, %v639_v35  ;;  %2740 = vmatprep.subr.bf16.mxu1 %v3350_v0  ;;  %v3010_v31 = vld [vmem:[#allocation7 + $0x8] sm:$0xff]  }
 0x1e2   : > { %3060 = vrcp.f32 %v615_v32  ;;  %v644_v44 = vmul.f32 1.442695, %v641_v39  ;;  %v3011_v32 = vld [vmem:[#allocation7] sm:$0xff]  }
 0x1e3   : > { %3062 = vpow2.f32 %v642_v38  ;;  %2741 = vmatpush3.bf16.msra.mxu1 %v3009_v30 }
 0x1e4   : > { %3064 = vpow2.f32 %v644_v44  ;;  %2754 = vmatprep.subr.bf16.mxu1 %v3350_v0 }
 0x1eb   : > { %v3059_v36 = vpop.eup %3058 }
 0x1ec   : > { %v620_v37 = vmul.f32 1.0614054, %v3059_v36 }
 0x1ee   : > { %v622_v40 = vadd.f32 -1.4531521, %v620_v37 }
 0x1ef   : > { %v3061_v41 = vpop.eup %3060 }
 0x1f0   : > { %v624_v42 = vmul.f32 %v3059_v36, %v622_v40  ;;  %v621_v43 = vmul.f32 1.0614054, %v3061_v41  ;;  %v3063_v57 = vpop.eup %3062 }
 0x1f1   : > { %v3065_v62 = vpop.eup %3064 }
 0x1f2   : > { %v626_v45 = vadd.f32 1.4214138, %v624_v42  ;;  %v623_v46 = vadd.f32 -1.4531521, %v621_v43  ;;  %v2534_v42 = vld [vmem:[%s3837_s4] ss:$0 sm:$0xff] }
 0x1f4   : > { %v628_v47 = vmul.f32 %v3059_v36, %v626_v45  ;;  %v625_v48 = vmul.f32 %v3061_v41, %v623_v46 }
 0x1f6   : > { %v630_v49 = vadd.f32 -0.28449672, %v628_v47  ;;  %v627_v50 = vadd.f32 1.4214138, %v625_v48 }
 0x1f8   : > { %v632_v51 = vmul.f32 %v3059_v36, %v630_v49  ;;  %v629_v52 = vmul.f32 %v3061_v41, %v627_v50 }
 0x1fa   : > { %v634_v53 = vadd.f32 0.2548296, %v632_v51  ;;  %v631_v54 = vadd.f32 -0.28449672, %v629_v52 }
 0x1fc   : > { %v636_v55 = vmul.f32 %v3059_v36, %v634_v53  ;;  %v633_v56 = vmul.f32 %v3061_v41, %v631_v54 }
 0x1fe   : > { %v646_v58 = vmul.f32 %v3063_v57, %v636_v55  ;;  %v635_v59 = vadd.f32 0.2548296, %v633_v56 }
 0x200   : > { %v648_v60 = vsub.f32 1.0, %v646_v58  ;;  %v637_v61 = vmul.f32 %v3061_v41, %v635_v59 }
 0x202   : > { %v652_v63 = vsub.f32 0.0, %v648_v60  ;;  %v647_v1 = vmul.f32 %v3065_v62, %v637_v61 }
 0x204   : > { %v654_v2 = vsel %vm650_vm7, %v652_v63, %v648_v60  ;;  %v649_v3 = vsub.f32 1.0, %v647_v1 }
 0x205   : > { %v656_v5 = vadd.f32 1.0, %v654_v2 }
 0x206   : > { %v653_v4 = vsub.f32 0.0, %v649_v3 }
 0x207   : > { %v658_v10 = vmul.f32 %v656_v5, %v606_v7 }
 0x208   : > { %v655_v6 = vsel %vm651_vm8, %v653_v4, %v649_v3 }
 0x209   : > { %v657_v9 = vadd.f32 1.0, %v655_v6 }
 0x20b   : > { %v659_v11 = vmul.f32 %v657_v9, %v607_v8 }
 0x20d   : > { %v660_v12 = vpack.c.bf16 %v659_v11, %v658_v10 }
 0x20f   : > { %v668_v13 = vshrl.u32 %v660_v12, 16  ;;  %v671_v15 = vshll.u32 %v660_v12, 16 }
 0x211   : > { %v670_v14 = vrot.slane %v668_v13, 7  ;;  %v679_v23 = vrot.slane %v671_v15, 1 }
 0x213   : > { %v673_v17 = vor.u32 %v671_v15, %v670_v14  ;;  %v680_v25 = vor.u32 %v679_v23, %v668_v13 }
 0x215   : > { %v678_v19 = vsel %vm3602_vm11, 0, %v673_v17  ;;  %v685_v28 = vsel %vm3617_vm15, %v680_v25, 0 }
 0x216   : > { %2711 = vmatmul.mubr.msk.bf16.vlgmr.msra.gmra.mxu0 %vm702_vm12, %v678_v19 }
 0x217   : > { %2715 = vmatpush3.bf16.msra.mxu0 %v3004_v18  ;;  %2718 = vmatprep.mubr.msk.bf16.mxu0 %vm3351_vm4, %v3350_v0 }
 0x218   : > { %2716 = vmatprep.subr.bf16.mxu0 %v3350_v0 }
 0x21b   : > { %2717 = vmatpush3.bf16.msra.mxu0 %v3005_v21 }
 0x21c   : > { %2722 = vmatprep.subr.bf16.mxu0 %v3350_v0 }
 0x21e   : > { %2719 = vmatmul.mubr.msk.bf16.vlgmr.msra.gmra.mxu0 %vm702_vm12, %v660_v12 }
 0x21f   : > { %2723 = vmatpush3.bf16.msra.mxu0 %v3006_v22  ;;  %2726 = vmatprep.mubr.msk.bf16.mxu0 %vm3351_vm4, %v3350_v0 }
 0x220   : > { %2724 = vmatprep.subr.bf16.mxu0 %v3350_v0 }
 0x223   : > { %2725 = vmatpush3.bf16.msra.mxu0 %v3007_v24 }
 0x224   : > { %2730 = vmatprep.subr.bf16.mxu0 %v3350_v0 }
 0x226   : > { %2727 = vmatmul.mubr.msk.bf16.vlgmr.msra.gmra.mxu0 %vm702_vm12, %v685_v28 }
 0x227   : > { %2734 = vmatprep.mubr.msk.bf16.mxu0 %vm3351_vm4, %v3350_v0  ;;  %2731 = vmatpush3.bf16.msra.mxu0 %v3010_v31 }
 0x228   : > { %2732 = vmatprep.subr.bf16.mxu0 %v3350_v0 }
 0x22b   : > { %2733 = vmatpush3.bf16.msra.mxu0 %v3011_v32 }
 0x22c   : > { %2746 = vmatprep.subr.bf16.mxu0 %v3350_v0 }
 0x2d6   : > { %v740_v33 = vpop.f32.mrf.mxu0 }
 0x2d8   : > { %v2712_v34 = vpop.f32.mrf.mxu0 }
 0x2da   : > { %v743_v35 = vpop.f32.mrf.mxu0 }
 0x2dc   : > { %v2713_v36 = vpop.f32.mrf.mxu0 }
 0x2de   : > { %v795_v37 = vpop.f32.mrf.mxu0 }
 0x2df   : > { %v796_v41 = vadd.f32 %v795_v37, %v740_v33 }
 0x2e0   : > { %v2720_v38 = vpop.f32.mrf.mxu0 }
 0x2e2   : > { %v798_v39 = vpop.f32.mrf.mxu0 }
 0x2e3   : > { %v799_v46 = vadd.f32 %v798_v39, %v743_v35 }
 0x2e4   : > { %v2721_v40 = vpop.f32.mrf.mxu0 }
 0x2e6   : > { %v856_v43 = vpop.f32.mrf.mxu0 }
 0x2e7   : > { %v863_v44 = vadd.f32 %v856_v43, %v796_v41 }
 0x2e8   : > { %v2728_v45 = vpop.f32.mrf.mxu0 }
 0x2e9   : > { %v871_v47 = vadd.f32 %v2534_v42, %v863_v44 }
 0x2ea   : > { %v859_v48 = vpop.f32.mrf.mxu0 }
 0x2eb   : > { %v875_v49 = vmul.f32 0.70710677, %v871_v47  ;;  %v864_v50 = vadd.f32 %v859_v48, %v799_v46  ;;  %v873_v38 = vmul.f32 0.5, %v871_v47  ;;  %v3013_v47 = vld [vmem:[#allocation7 + $0x20] sm:$0xff]  }
 0x2ec   : > { %v2729_v51 = vpop.f32.mrf.mxu0 }
 0x2ed   : > { %v877_v52 = vand.u32 2147483647, %v875_v49  ;;  %v872_v53 = vadd.f32 %v2534_v42, %v864_v50  ;;  %vm917_vm0 = vcmp.lt.f32.partialorder %v875_v49, 0.0  ;;  %v3012_v49 = vld [vmem:[#allocation7 + $0x28] sm:$0xff]  }
 0x2ef   : > { %v879_v54 = vmul.f32 0.3275911, %v877_v52  ;;  %v876_v55 = vmul.f32 0.70710677, %v872_v53  ;;  %v905_v60 = vmul.f32 %v877_v52, %v877_v52  ;;  %v874_v39 = vmul.f32 0.5, %v872_v53 }
 0x2f1   : > { %v881_v56 = vadd.f32 1.0, %v879_v54  ;;  %v878_v57 = vand.u32 2147483647, %v876_v55  ;;  %v907_v61 = vsub.f32 0.0, %v905_v60  ;;  %vm918_vm1 = vcmp.lt.f32.partialorder %v876_v55, 0.0  ;;  %v3015_v54 = vld [vmem:[#allocation5 + $0x38] sm:$0xff]  }
 0x2f2   : > { %v3016_v55 = vld [vmem:[#allocation5 + $0x40] sm:$0xff]  }
 0x2f3   : > { %3066 = vrcp.f32 %v881_v56  ;;  %v880_v58 = vmul.f32 0.3275911, %v878_v57  ;;  %v906_v62 = vmul.f32 %v878_v57, %v878_v57  ;;  %v909_v2 = vmul.f32 1.442695, %v907_v61  ;;  %v3017_v56 = vld [vmem:[#allocation5 + $0x30] sm:$0xff]  }
 0x2f5   : > { %v882_v59 = vadd.f32 1.0, %v880_v58  ;;  %v908_v3 = vsub.f32 0.0, %v906_v62 }
 0x2f7   : > { %3068 = vrcp.f32 %v882_v59  ;;  %v911_v8 = vmul.f32 1.442695, %v908_v3 }
 0x2f8   : > { %3070 = vpow2.f32 %v909_v2  ;;  %v2544_v2 = vld [vmem:[#allocation8] ss:$0 sm:$0xff] }
 0x2f9   : > { %3072 = vpow2.f32 %v911_v8 }
 0x300   : > { %v3067_v63 = vpop.eup %3066 }
 0x301   : > { %v887_v1 = vmul.f32 1.0614054, %v3067_v63 }
 0x303   : > { %v889_v4 = vadd.f32 -1.4531521, %v887_v1 }
 0x304   : > { %v3069_v5 = vpop.eup %3068 }
 0x305   : > { %v891_v6 = vmul.f32 %v3067_v63, %v889_v4  ;;  %v888_v7 = vmul.f32 1.0614054, %v3069_v5  ;;  %v3071_v23 = vpop.eup %3070 }
 0x306   : > { %v3073_v30 = vpop.eup %3072 }
 0x307   : > { %v893_v9 = vadd.f32 1.4214138, %v891_v6  ;;  %v890_v10 = vadd.f32 -1.4531521, %v888_v7 }
 0x309   : > { %v895_v11 = vmul.f32 %v3067_v63, %v893_v9  ;;  %v892_v12 = vmul.f32 %v3069_v5, %v890_v10 }
 0x30b   : > { %v897_v13 = vadd.f32 -0.28449672, %v895_v11  ;;  %v894_v14 = vadd.f32 1.4214138, %v892_v12 }
 0x30d   : > { %v899_v15 = vmul.f32 %v3067_v63, %v897_v13  ;;  %v896_v17 = vmul.f32 %v3069_v5, %v894_v14 }
 0x30f   : > { %v901_v18 = vadd.f32 0.2548296, %v899_v15  ;;  %v898_v19 = vadd.f32 -0.28449672, %v896_v17 }
 0x311   : > { %v903_v21 = vmul.f32 %v3067_v63, %v901_v18  ;;  %v900_v22 = vmul.f32 %v3069_v5, %v898_v19 }
 0x313   : > { %v913_v24 = vmul.f32 %v3071_v23, %v903_v21  ;;  %v902_v25 = vadd.f32 0.2548296, %v900_v22 }
 0x315   : > { %v915_v28 = vsub.f32 1.0, %v913_v24  ;;  %v904_v29 = vmul.f32 %v3069_v5, %v902_v25 }
 0x317   : > { %v919_v31 = vsub.f32 0.0, %v915_v28  ;;  %v914_v32 = vmul.f32 %v3073_v30, %v904_v29 }
 0x319   : > { %v921_v33 = vsel %vm917_vm0, %v919_v31, %v915_v28  ;;  %v916_v34 = vsub.f32 1.0, %v914_v32 }
 0x31a   : > { %v923_v36 = vadd.f32 1.0, %v921_v33 }
 0x31b   : > { %v920_v35 = vsub.f32 0.0, %v916_v34 }
 0x31c   : > { %v925_v41 = vmul.f32 %v923_v36, %v873_v38 }
 0x31d   : > { %v922_v37 = vsel %vm918_vm1, %v920_v35, %v916_v34 }
 0x31e   : > { %v924_v40 = vadd.f32 1.0, %v922_v37 }
 0x320   : > { %v926_v42 = vmul.f32 %v924_v40, %v874_v39 }
 0x322   : > { %v927_v43 = vpack.c.bf16 %v926_v42, %v925_v41 }
 0x324   : > { %2743 = vmatmul.mubr.msk.bf16.vlgmr.msra.gmra.mxu1 %vm702_vm12, %v927_v43  ;;  %v935_v44 = vshrl.u32 %v927_v43, 16  ;;  %v938_v46 = vshll.u32 %v927_v43, 16 }
 0x325   : > { %2758 = vmatprep.mubr.msk.bf16.mxu1 %vm3351_vm4, %v3350_v0  ;;  %2755 = vmatpush3.bf16.msra.mxu1 %v3015_v54 }
 0x326   : > { %v937_v45 = vrot.slane %v935_v44, 7  ;;  %v943_v51 = vrot.slane %v938_v46, 1  ;;  %2756 = vmatprep.subr.bf16.mxu1 %v3350_v0 }
 0x328   : > { %v940_v48 = vor.u32 %v938_v46, %v937_v45  ;;  %v944_v52 = vor.u32 %v943_v51, %v935_v44 }
 0x329   : > { %2757 = vmatpush3.bf16.msra.mxu1 %v3017_v56 }
 0x32a   : > { %v942_v50 = vsel %vm3602_vm11, 0, %v940_v48  ;;  %v946_v53 = vsel %vm3617_vm15, %v944_v52, 0  ;;  %2770 = vmatprep.subr.bf16.mxu1 %v3350_v0  ;;  %vm1784_vm11 = vcmask 1045504  }
 0x32b   : > { %2735 = vmatmul.mubr.msk.bf16.vlgmr.msra.gmra.mxu0 %vm702_vm12, %v942_v50 }
 0x32c   : > { %2747 = vmatpush3.bf16.msra.mxu0 %v3012_v49  ;;  %2750 = vmatprep.mubr.msk.bf16.mxu0 %vm3351_vm4, %v3350_v0 }
 0x32d   : > { %2748 = vmatprep.subr.bf16.mxu0 %v3350_v0 }
 0x330   : > { %2749 = vmatpush3.bf16.msra.mxu0 %v3013_v47 }
 0x331   : > { %2762 = vmatprep.subr.bf16.mxu0 %v3350_v0 }
 0x333   : > { %2751 = vmatmul.mubr.msk.bf16.vlgmr.msra.gmra.mxu0 %vm702_vm12, %v946_v53 }
 0x334   : > { %2766 = vmatprep.mubr.msk.bf16.mxu0 %vm3351_vm4, %v3350_v0  ;;  %2763 = vmatpush3.bf16.msra.mxu0 %v3014_v16 }
 0x335   : > { %2764 = vmatprep.subr.bf16.mxu0 %v3350_v0 }
 0x338   : > { %2765 = vmatpush3.bf16.msra.mxu0 %v3016_v55 }
 0x339   : > { %2778 = vmatprep.subr.bf16.mxu0 %v3350_v0 }
 0x3e4   : > { %v1055_v27 = vpop.f32.mrf.mxu1 }
 0x3e6   : > { %v2744_v57 = vpop.f32.mrf.mxu1 }
 0x3e8   : > { %v1058_v58 = vpop.f32.mrf.mxu1 }
 0x3ea   : > { %v2745_v59 = vpop.f32.mrf.mxu1 }
 0x3eb   : > { %v1000_v60 = vpop.f32.mrf.mxu0 }
 0x3ec   : > { %v1056_v1 = vadd.f32 %v1055_v27, %v1000_v60 }
 0x3ed   : > { %v2736_v61 = vpop.f32.mrf.mxu0 }
 0x3ef   : > { %v1003_v62 = vpop.f32.mrf.mxu0 }
 0x3f0   : > { %v1059_v6 = vadd.f32 %v1058_v58, %v1003_v62 }
 0x3f1   : > { %v2737_v63 = vpop.f32.mrf.mxu0 }
 0x3f3   : > { %v1116_v3 = vpop.f32.mrf.mxu0 }
 0x3f4   : > { %v1123_v4 = vadd.f32 %v1116_v3, %v1056_v1  ;;  %v3018_v3 = vld [vmem:[#allocation5 + $0x58] sm:$0xff]  }
 0x3f5   : > { %v2752_v5 = vpop.f32.mrf.mxu0 }
 0x3f6   : > { %v1131_v7 = vadd.f32 %v2544_v2, %v1123_v4  ;;  %v3019_v5 = vld [vmem:[#allocation5 + $0x50] sm:$0xff]  }
 0x3f7   : > { %v1119_v8 = vpop.f32.mrf.mxu0 }
 0x3f8   : > { %v3654_v9 = vadd.f32 %v1131_v7, %v3592_v20  ;;  %v1124_v10 = vadd.f32 %v1119_v8, %v1059_v6  ;;  %v3020_v8 = vld [vmem:[#allocation7 + $0x48] sm:$0xff]  }
 0x3f9   : > { %v2753_v11 = vpop.f32.mrf.mxu0 }
 0x3fa   : > { %v1137_v12 = vmul.f32 0.70710677, %v3654_v9  ;;  %v1132_v13 = vadd.f32 %v2544_v2, %v1124_v10  ;;  %v1135_v59 = vmul.f32 0.5, %v3654_v9  ;;  %v3021_v10 = vld [vmem:[#allocation7 + $0x38] sm:$0xff]   ;;  %v3022_v11 = vld [vmem:[#allocation7 + $0x40] sm:$0xff]  }
 0x3fc   : > { %v1139_v14 = vand.u32 2147483647, %v1137_v12  ;;  %v3658_v15 = vadd.f32 %v1132_v13, %v3596_v26  ;;  %vm1179_vm2 = vcmp.lt.f32.partialorder %v1137_v12, 0.0  ;;  %v3023_v12 = vld [vmem:[#allocation7 + $0x30] sm:$0xff]  }
 0x3fe   : > { %v1141_v17 = vmul.f32 0.3275911, %v1139_v14  ;;  %v1138_v18 = vmul.f32 0.70710677, %v3658_v15  ;;  %v1167_v20 = vmul.f32 %v1139_v14, %v1139_v14  ;;  %v1136_v60 = vmul.f32 0.5, %v3658_v15 }
 0x400   : > { %v1143_v19 = vadd.f32 1.0, %v1141_v17  ;;  %v1140_v21 = vand.u32 2147483647, %v1138_v18  ;;  %v1169_v24 = vsub.f32 0.0, %v1167_v20  ;;  %vm1180_vm5 = vcmp.lt.f32.partialorder %v1138_v18, 0.0 }
 0x402   : > { %3074 = vrcp.f32 %v1143_v19  ;;  %v1142_v22 = vmul.f32 0.3275911, %v1140_v21  ;;  %v1168_v25 = vmul.f32 %v1140_v21, %v1140_v21  ;;  %v1171_v30 = vmul.f32 1.442695, %v1169_v24  ;;  %v2555_v24 = vld [vmem:[%s3837_s4 + $0x1] ss:$0 sm:$0xff] }
 0x404   : > { %v1144_v23 = vadd.f32 1.0, %v1142_v22  ;;  %v1170_v31 = vsub.f32 0.0, %v1168_v25 }
 0x406   : > { %3076 = vrcp.f32 %v1144_v23  ;;  %v1173_v35 = vmul.f32 1.442695, %v1170_v31 }
 0x407   : > { %3078 = vpow2.f32 %v1171_v30 }
 0x408   : > { %3080 = vpow2.f32 %v1173_v35 }
 0x40f   : > { %v3075_v28 = vpop.eup %3074 }
 0x410   : > { %v1149_v29 = vmul.f32 1.0614054, %v3075_v28 }
 0x412   : > { %v1151_v32 = vadd.f32 -1.4531521, %v1149_v29 }
 0x413   : > { %v3077_v33 = vpop.eup %3076 }
 0x414   : > { %v1153_v26 = vmul.f32 %v3075_v28, %v1151_v32  ;;  %v1150_v34 = vmul.f32 1.0614054, %v3077_v33  ;;  %v3079_v49 = vpop.eup %3078 }
 0x415   : > { %v3081_v53 = vpop.eup %3080 }
 0x416   : > { %v1155_v36 = vadd.f32 1.4214138, %v1153_v26  ;;  %v1152_v37 = vadd.f32 -1.4531521, %v1150_v34 }
 0x418   : > { %v1157_v38 = vmul.f32 %v3075_v28, %v1155_v36  ;;  %v1154_v39 = vmul.f32 %v3077_v33, %v1152_v37 }
 0x41a   : > { %v1159_v40 = vadd.f32 -0.28449672, %v1157_v38  ;;  %v1156_v41 = vadd.f32 1.4214138, %v1154_v39 }
 0x41c   : > { %v1161_v42 = vmul.f32 %v3075_v28, %v1159_v40  ;;  %v1158_v43 = vmul.f32 %v3077_v33, %v1156_v41 }
 0x41e   : > { %v1163_v44 = vadd.f32 0.2548296, %v1161_v42  ;;  %v1160_v45 = vadd.f32 -0.28449672, %v1158_v43 }
 0x420   : > { %v1165_v46 = vmul.f32 %v3075_v28, %v1163_v44  ;;  %v1162_v48 = vmul.f32 %v3077_v33, %v1160_v45 }
 0x422   : > { %v1175_v50 = vmul.f32 %v3079_v49, %v1165_v46  ;;  %v1164_v51 = vadd.f32 0.2548296, %v1162_v48 }
 0x424   : > { %v1177_v47 = vsub.f32 1.0, %v1175_v50  ;;  %v1166_v52 = vmul.f32 %v3077_v33, %v1164_v51 }
 0x426   : > { %v1181_v16 = vsub.f32 0.0, %v1177_v47  ;;  %v1176_v54 = vmul.f32 %v3081_v53, %v1166_v52 }
 0x428   : > { %v1183_v55 = vsel %vm1179_vm2, %v1181_v16, %v1177_v47  ;;  %v1178_v56 = vsub.f32 1.0, %v1176_v54 }
 0x429   : > { %v1185_v57 = vadd.f32 1.0, %v1183_v55 }
 0x42a   : > { %v1182_v27 = vsub.f32 0.0, %v1178_v56 }
 0x42b   : > { %v1187_v62 = vmul.f32 %v1185_v57, %v1135_v59 }
 0x42c   : > { %v1184_v58 = vsel %vm1180_vm5, %v1182_v27, %v1178_v56 }
 0x42d   : > { %v1186_v61 = vadd.f32 1.0, %v1184_v58 }
 0x42f   : > { %v1188_v63 = vmul.f32 %v1186_v61, %v1136_v60 }
 0x431   : > { %v1189_v1 = vpack.c.bf16 %v1188_v63, %v1187_v62 }
 0x433   : > { %2767 = vmatmul.mubr.msk.bf16.vlgmr.msra.gmra.mxu0 %vm702_vm12, %v1189_v1  ;;  %v1198_v2 = vrot.slane %v1189_v1, 7  ;;  %v1203_v6 = vrot.slane %v1189_v1, 1 }
 0x434   : > { %2782 = vmatprep.mubr.msk.bf16.mxu0 %vm3351_vm4, %v3350_v0  ;;  %2779 = vmatpush3.bf16.msra.mxu0 %v3021_v10 }
 0x435   : > { %v1202_v4 = vsel %vm675_vm9, 0, %v1198_v2  ;;  %v1206_v7 = vsel %vm1204_vm6, %v1203_v6, 0  ;;  %2780 = vmatprep.subr.bf16.mxu0 %v3350_v0 }
 0x436   : > { %2759 = vmatmul.mubr.msk.bf16.vlgmr.msra.gmra.mxu1 %vm702_vm12, %v1202_v4 }
 0x437   : > { %2771 = vmatpush3.bf16.msra.mxu1 %v3018_v3  ;;  %2774 = vmatprep.mubr.msk.bf16.mxu1 %vm3351_vm4, %v3350_v0 }
 0x438   : > { %2772 = vmatprep.subr.bf16.mxu1 %v3350_v0  ;;  %2781 = vmatpush3.bf16.msra.mxu0 %v3023_v12 }
 0x439   : > { %2794 = vmatprep.subr.bf16.mxu0 %v3350_v0 }
 0x43b   : > { %2773 = vmatpush3.bf16.msra.mxu1 %v3019_v5 }
 0x43c   : > { %2786 = vmatprep.subr.bf16.mxu1 %v3350_v0 }
 0x43e   : > { %2775 = vmatmul.mubr.msk.bf16.vlgmr.msra.gmra.mxu1 %vm702_vm12, %v1206_v7 }
 0x43f   : > { %2790 = vmatprep.mubr.msk.bf16.mxu1 %vm3351_vm4, %v3350_v0  ;;  %2787 = vmatpush3.bf16.msra.mxu1 %v3020_v8 }
 0x440   : > { %2788 = vmatprep.subr.bf16.mxu1 %v3350_v0 }
 0x443   : > { %2789 = vmatpush3.bf16.msra.mxu1 %v3022_v11 }
 0x444   : > { %2802 = vmatprep.subr.bf16.mxu1 %v3350_v0 }
 0x4f3   : > { %v1316_v13 = vpop.f32.mrf.mxu0 }
 0x4f5   : > { %v2768_v14 = vpop.f32.mrf.mxu0 }
 0x4f6   : > { %v1260_v17 = vpop.f32.mrf.mxu1 }
 0x4f7   : > { %v1319_v18 = vpop.f32.mrf.mxu0  ;;  %v1317_v20 = vadd.f32 %v1316_v13, %v1260_v17 }
 0x4f8   : > { %v2760_v19 = vpop.f32.mrf.mxu1 }
 0x4f9   : > { %v2769_v21 = vpop.f32.mrf.mxu0 }
 0x4fa   : > { %v1263_v22 = vpop.f32.mrf.mxu1 }
 0x4fb   : > { %v1320_v30 = vadd.f32 %v1319_v18, %v1263_v22 }
 0x4fc   : > { %v2761_v23 = vpop.f32.mrf.mxu1 }
 0x4fe   : > { %v1376_v25 = vpop.f32.mrf.mxu1 }
 0x4ff   : > { %v1383_v28 = vadd.f32 %v1376_v25, %v1317_v20  ;;  %v3024_v25 = vld [vmem:[#allocation7 + $0x58] sm:$0xff]  }
 0x500   : > { %v2776_v29 = vpop.f32.mrf.mxu1 }
 0x501   : > { %v1391_v31 = vadd.f32 %v2555_v24, %v1383_v28  ;;  %v3025_v29 = vld [vmem:[#allocation7 + $0x50] sm:$0xff]  }
 0x502   : > { %v1379_v32 = vpop.f32.mrf.mxu1 }
 0x503   : > { %v1395_v33 = vmul.f32 0.70710677, %v1391_v31  ;;  %v1384_v26 = vadd.f32 %v1379_v32, %v1320_v30  ;;  %v1393_v18 = vmul.f32 0.5, %v1391_v31  ;;  %v3026_v32 = vld [vmem:[#allocation11 + $0x8] sm:$0xff]  }
 0x504   : > { %v2777_v34 = vpop.f32.mrf.mxu1 }
 0x505   : > { %v1397_v35 = vand.u32 2147483647, %v1395_v33  ;;  %v1392_v36 = vadd.f32 %v2555_v24, %v1384_v26  ;;  %vm1437_vm7 = vcmp.lt.f32.partialorder %v1395_v33, 0.0  ;;  %v3027_v33 = vld [vmem:[#allocation11] sm:$0xff]  }
 0x506   : > { %v3029_v26 = vld [vmem:[%s3840_s7 + $0x8] sm:$0xff]   ;;  %v3031_v34 = vld [vmem:[%s3840_s7] sm:$0xff]  }
 0x507   : > { %v1399_v37 = vmul.f32 0.3275911, %v1397_v35  ;;  %v1396_v38 = vmul.f32 0.70710677, %v1392_v36  ;;  %v1425_v43 = vmul.f32 %v1397_v35, %v1397_v35  ;;  %v1394_v19 = vmul.f32 0.5, %v1392_v36 }
 0x509   : > { %v1401_v39 = vadd.f32 1.0, %v1399_v37  ;;  %v1398_v40 = vand.u32 2147483647, %v1396_v38  ;;  %v1427_v44 = vsub.f32 0.0, %v1425_v43  ;;  %vm1438_vm8 = vcmp.lt.f32.partialorder %v1396_v38, 0.0 }
 0x50b   : > { %3082 = vrcp.f32 %v1401_v39  ;;  %v1400_v41 = vmul.f32 0.3275911, %v1398_v40  ;;  %v1426_v45 = vmul.f32 %v1398_v40, %v1398_v40  ;;  %v1429_v49 = vmul.f32 1.442695, %v1427_v44  ;;  %v2565_v44 = vld [vmem:[#allocation8 + $0x1] ss:$0 sm:$0xff] }
 0x50d   : > { %v1402_v42 = vadd.f32 1.0, %v1400_v41  ;;  %v1428_v50 = vsub.f32 0.0, %v1426_v45 }
 0x50f   : > { %3084 = vrcp.f32 %v1402_v42  ;;  %v1431_v16 = vmul.f32 1.442695, %v1428_v50 }
 0x510   : > { %3086 = vpow2.f32 %v1429_v49 }
 0x511   : > { %3088 = vpow2.f32 %v1431_v16 }
 0x518   : > { %v3083_v46 = vpop.eup %3082 }
 0x519   : > { %v1407_v48 = vmul.f32 1.0614054, %v3083_v46 }
 0x51b   : > { %v1409_v51 = vadd.f32 -1.4531521, %v1407_v48 }
 0x51c   : > { %v3085_v47 = vpop.eup %3084 }
 0x51d   : > { %v1411_v52 = vmul.f32 %v3083_v46, %v1409_v51  ;;  %v1408_v53 = vmul.f32 1.0614054, %v3085_v47  ;;  %v3087_v2 = vpop.eup %3086 }
 0x51e   : > { %v3089_v7 = vpop.eup %3088 }
 0x51f   : > { %v1413_v54 = vadd.f32 1.4214138, %v1411_v52  ;;  %v1410_v55 = vadd.f32 -1.4531521, %v1408_v53 }
 0x521   : > { %v1415_v56 = vmul.f32 %v3083_v46, %v1413_v54  ;;  %v1412_v27 = vmul.f32 %v3085_v47, %v1410_v55 }
 0x523   : > { %v1417_v57 = vadd.f32 -0.28449672, %v1415_v56  ;;  %v1414_v58 = vadd.f32 1.4214138, %v1412_v27  ;;  %v3028_v27 = vld [vmem:[%s3840_s7 + $0x18] sm:$0xff]  }
 0x525   : > { %v1419_v59 = vmul.f32 %v3083_v46, %v1417_v57  ;;  %v1416_v60 = vmul.f32 %v3085_v47, %v1414_v58 }
 0x527   : > { %v1421_v61 = vadd.f32 0.2548296, %v1419_v59  ;;  %v1418_v62 = vadd.f32 -0.28449672, %v1416_v60 }
 0x529   : > { %v1423_v63 = vmul.f32 %v3083_v46, %v1421_v61  ;;  %v1420_v1 = vmul.f32 %v3085_v47, %v1418_v62  ;;  %v3030_v61 = vld [vmem:[%s3840_s7 + $0x10] sm:$0xff]  }
 0x52b   : > { %v1433_v3 = vmul.f32 %v3087_v2, %v1423_v63  ;;  %v1422_v4 = vadd.f32 0.2548296, %v1420_v1 }
 0x52d   : > { %v1435_v5 = vsub.f32 1.0, %v1433_v3  ;;  %v1424_v6 = vmul.f32 %v3085_v47, %v1422_v4 }
 0x52f   : > { %v1439_v8 = vsub.f32 0.0, %v1435_v5  ;;  %v1434_v10 = vmul.f32 %v3089_v7, %v1424_v6 }
 0x531   : > { %v1441_v11 = vsel %vm1437_vm7, %v1439_v8, %v1435_v5  ;;  %v1436_v12 = vsub.f32 1.0, %v1434_v10 }
 0x532   : > { %v1443_v14 = vadd.f32 1.0, %v1441_v11 }
 0x533   : > { %v1440_v13 = vsub.f32 0.0, %v1436_v12 }
 0x534   : > { %v1445_v22 = vmul.f32 %v1443_v14, %v1393_v18 }
 0x535   : > { %v1442_v17 = vsel %vm1438_vm8, %v1440_v13, %v1436_v12 }
 0x536   : > { %v1444_v21 = vadd.f32 1.0, %v1442_v17 }
 0x538   : > { %v1446_v23 = vmul.f32 %v1444_v21, %v1394_v19 }
 0x53a   : > { %v1447_v20 = vpack.c.bf16 %v1446_v23, %v1445_v22 }
 0x53c   : > { %2791 = vmatmul.mubr.msk.bf16.vlgmr.msra.gmra.mxu1 %vm702_vm12, %v1447_v20  ;;  %v1456_v24 = vrot.slane %v1447_v20, 7  ;;  %v1459_v30 = vrot.slane %v1447_v20, 1 }
 0x53d   : > { %2806 = vmatprep.mubr.msk.bf16.mxu1 %vm3351_vm4, %v3350_v0  ;;  %2803 = vmatpush3.bf16.msra.mxu1 %v3026_v32 }
 0x53e   : > { %v1458_v28 = vsel %vm675_vm9, 0, %v1456_v24  ;;  %v1461_v31 = vsel %vm1204_vm6, %v1459_v30, 0  ;;  %2804 = vmatprep.subr.bf16.mxu1 %v3350_v0 }
 0x53f   : > { %2783 = vmatmul.mubr.msk.bf16.vlgmr.msra.gmra.mxu0 %vm702_vm12, %v1458_v28 }
 0x540   : > { %2795 = vmatpush3.bf16.msra.mxu0 %v3024_v25  ;;  %2798 = vmatprep.mubr.msk.bf16.mxu0 %vm3351_vm4, %v3350_v0 }
 0x541   : > { %2796 = vmatprep.subr.bf16.mxu0 %v3350_v0  ;;  %2805 = vmatpush3.bf16.msra.mxu1 %v3027_v33 }
 0x542   : > { %2818 = vmatprep.subr.bf16.mxu1 %v3350_v0 }
 0x544   : > { %2797 = vmatpush3.bf16.msra.mxu0 %v3025_v29 }
 0x545   : > { %2810 = vmatprep.subr.bf16.mxu0 %v3350_v0 }
 0x547   : > { %2799 = vmatmul.mubr.msk.bf16.vlgmr.msra.gmra.mxu0 %vm702_vm12, %v1461_v31 }
 0x548   : > { %2814 = vmatprep.mubr.msk.bf16.mxu0 %vm3351_vm4, %v3350_v0  ;;  %2811 = vmatpush3.bf16.msra.mxu0 %v3029_v26 }
 0x549   : > { %2812 = vmatprep.subr.bf16.mxu0 %v3350_v0 }
 0x54c   : > { %2813 = vmatpush3.bf16.msra.mxu0 %v3031_v34 }
 0x54d   : > { %2826 = vmatprep.subr.bf16.mxu0 %v3350_v0 }
 0x5fc   : > { %v1571_v35 = vpop.f32.mrf.mxu1 }
 0x5fe   : > { %v2792_v36 = vpop.f32.mrf.mxu1 }
 0x5ff   : > { %v1515_v37 = vpop.f32.mrf.mxu0 }
 0x600   : > { %v1574_v38 = vpop.f32.mrf.mxu1  ;;  %v1572_v43 = vadd.f32 %v1571_v35, %v1515_v37 }
 0x601   : > { %v2784_v39 = vpop.f32.mrf.mxu0 }
 0x602   : > { %v2793_v40 = vpop.f32.mrf.mxu1 }
 0x603   : > { %v1518_v41 = vpop.f32.mrf.mxu0 }
 0x604   : > { %v1575_v49 = vadd.f32 %v1574_v38, %v1518_v41 }
 0x605   : > { %v2785_v42 = vpop.f32.mrf.mxu0 }
 0x607   : > { %v1631_v45 = vpop.f32.mrf.mxu0 }
 0x608   : > { %v1638_v46 = vadd.f32 %v1631_v45, %v1572_v43 }
 0x609   : > { %v2800_v48 = vpop.f32.mrf.mxu0 }
 0x60a   : > { %v1646_v50 = vadd.f32 %v2565_v44, %v1638_v46 }
 0x60b   : > { %v1634_v51 = vpop.f32.mrf.mxu0 }
 0x60c   : > { %v3707_v47 = vadd.f32 %v1646_v50, %v3654_v9  ;;  %v1639_v52 = vadd.f32 %v1634_v51, %v1575_v49  ;;  %v3032_v49 = vld [vmem:[%s3840_s7 + $0x28] sm:$0xff]   ;;  %v3033_v51 = vld [vmem:[%s3840_s7 + $0x20] sm:$0xff]  }
 0x60d   : > { %v2801_v53 = vpop.f32.mrf.mxu0 }
 0x60e   : > { %v1720_v16 = vmul.f32 0.70710677, %v3707_v47  ;;  %v1647_v54 = vadd.f32 %v2565_v44, %v1639_v52  ;;  %v1718_v41 = vmul.f32 0.5, %v3707_v47  ;;  %v3034_v53 = vld [vmem:[#allocation10 + $0x78] sm:$0xff]  }
 0x610   : > { %v1722_v55 = vand.u32 2147483647, %v1720_v16  ;;  %v1649_v56 = vadd.f32 %v1647_v54, %v3658_v15  ;;  %vm1762_vm9 = vcmp.lt.f32.partialorder %v1720_v16, 0.0  ;;  %v3035_v16 = vld [vmem:[#allocation10 + $0x38] sm:$0xff]   ;;  %v3036_v54 = vld [vmem:[#allocation10 + $0x70] sm:$0xff]  }
 0x612   : > { %v1724_v57 = vmul.f32 0.3275911, %v1722_v55  ;;  %v1650_v58 = vpack.c.bf16 %v1649_v56, %v3707_v47  ;;  %v1721_v59 = vmul.f32 0.70710677, %v1649_v56  ;;  %v1750_v63 = vmul.f32 %v1722_v55, %v1722_v55  ;;  %v3037_v55 = vld [vmem:[#allocation10 + $0x30] sm:$0xff]  }
 0x613   : > { %v1719_v42 = vmul.f32 0.5, %v1649_v56  ;;  %v3038_v56 = vld [vmem:[#allocation10 + $0x68] sm:$0xff]  }
 0x614   : > { %v1726_v60 = vadd.f32 1.0, %v1724_v57  ;;  %2807 = vmatmul.mubr.msk.bf16.vlgmr.msra.gmra.mxu1 %vm702_vm12, %v1650_v58  ;;  %v1723_v9 = vand.u32 2147483647, %v1721_v59  ;;  %v1752_v1 = vsub.f32 0.0, %v1750_v63  ;;  %vm1763_vm10 = vcmp.lt.f32.partialorder %v1721_v59, 0.0  ;;  %v3040_v57 = vld [vmem:[#allocation10 + $0x60] sm:$0xff]  }
 0x615   : > { %2819 = vmatpush3.bf16.msra.mxu1 %v3028_v27  ;;  %2822 = vmatprep.mubr.msk.bf16.mxu1 %vm3351_vm4, %v3350_v0  ;;  %v3039_v27 = vld [vmem:[#allocation10 + $0x28] sm:$0xff]   ;;  %v3041_v58 = vld [vmem:[#allocation10 + $0x20] sm:$0xff]   ;;  %v3042_v59 = vld [vmem:[#allocation10 + $0x58] sm:$0xff]  }
 0x616   : > { %3090 = vrcp.f32 %v1726_v60  ;;  %2820 = vmatprep.subr.bf16.mxu1 %v3350_v0  ;;  %v1725_v15 = vmul.f32 0.3275911, %v1723_v9  ;;  %v1751_v2 = vmul.f32 %v1723_v9, %v1723_v9  ;;  %v1754_v5 = vmul.f32 1.442695, %v1752_v1  ;;  %v3043_v60 = vld [vmem:[#allocation10 + $0x18] sm:$0xff]   ;;  %v3044_v9 = vld [vmem:[#allocation10 + $0x50] sm:$0xff]  }
 0x617   : > { %v3048_v63 = vld [vmem:[#allocation10 + $0x40] sm:$0xff]  }
 0x618   : > { %v1727_v62 = vadd.f32 1.0, %v1725_v15  ;;  %v1753_v6 = vsub.f32 0.0, %v1751_v2  ;;  %v3046_v15 = vld [vmem:[#allocation10 + $0x48] sm:$0xff]   ;;  %v3049_v1 = vld [vmem:[#allocation10] sm:$0xff]  }
 0x619   : > { %2821 = vmatpush3.bf16.msra.mxu1 %v3030_v61  ;;  %v3045_v61 = vld [vmem:[#allocation10 + $0x10] sm:$0xff]  }
 0x61a   : > { %2834 = vmatprep.subr.bf16.mxu1 %v3350_v0  ;;  %3092 = vrcp.f32 %v1727_v62  ;;  %v1756_v12 = vmul.f32 1.442695, %v1753_v6  ;;  %v3047_v62 = vld [vmem:[#allocation10 + $0x8] sm:$0xff]  }
 0x61b   : > { %3094 = vpow2.f32 %v1754_v5 }
 0x61c   : > { %3096 = vpow2.f32 %v1756_v12 }
 0x623   : > { %v3091_v3 = vpop.eup %3090 }
 0x624   : > { %v1732_v4 = vmul.f32 1.0614054, %v3091_v3 }
 0x626   : > { %v1734_v7 = vadd.f32 -1.4531521, %v1732_v4 }
 0x627   : > { %v3093_v8 = vpop.eup %3092 }
 0x628   : > { %v1736_v10 = vmul.f32 %v3091_v3, %v1734_v7  ;;  %v1733_v11 = vmul.f32 1.0614054, %v3093_v8  ;;  %v3095_v28 = vpop.eup %3094 }
 0x629   : > { %v3097_v26 = vpop.eup %3096 }
 0x62a   : > { %v1738_v13 = vadd.f32 1.4214138, %v1736_v10  ;;  %v1735_v14 = vadd.f32 -1.4531521, %v1733_v11 }
 0x62c   : > { %v1740_v17 = vmul.f32 %v3091_v3, %v1738_v13  ;;  %v1737_v18 = vmul.f32 %v3093_v8, %v1735_v14 }
 0x62e   : > { %v1742_v19 = vadd.f32 -0.28449672, %v1740_v17  ;;  %v1739_v21 = vadd.f32 1.4214138, %v1737_v18  ;;  %v2587_v18 = vld [vmem:[%s3841_s8] ss:$0 sm:$0xff] }
 0x630   : > { %v1744_v22 = vmul.f32 %v3091_v3, %v1742_v19  ;;  %v1741_v23 = vmul.f32 %v3093_v8, %v1739_v21 }
 0x632   : > { %v1746_v20 = vadd.f32 0.2548296, %v1744_v22  ;;  %v1743_v24 = vadd.f32 -0.28449672, %v1741_v23 }
 0x634   : > { %v1748_v25 = vmul.f32 %v3091_v3, %v1746_v20  ;;  %v1745_v29 = vmul.f32 %v3093_v8, %v1743_v24 }
 0x636   : > { %v1758_v30 = vmul.f32 %v3095_v28, %v1748_v25  ;;  %v1747_v31 = vadd.f32 0.2548296, %v1745_v29 }
 0x638   : > { %v1760_v32 = vsub.f32 1.0, %v1758_v30  ;;  %v1749_v33 = vmul.f32 %v3093_v8, %v1747_v31 }
 0x63a   : > { %v1764_v34 = vsub.f32 0.0, %v1760_v32  ;;  %v1759_v35 = vmul.f32 %v3097_v26, %v1749_v33 }
 0x63c   : > { %v1766_v36 = vsel %vm1762_vm9, %v1764_v34, %v1760_v32  ;;  %v1761_v37 = vsub.f32 1.0, %v1759_v35 }
 0x63d   : > { %v1768_v39 = vadd.f32 1.0, %v1766_v36 }
 0x63e   : > { %v1765_v38 = vsub.f32 0.0, %v1761_v37 }
 0x63f   : > { %v1770_v44 = vmul.f32 %v1768_v39, %v1718_v41 }
 0x640   : > { %v1767_v40 = vsel %vm1763_vm10, %v1765_v38, %v1761_v37 }
 0x641   : > { %v1769_v43 = vadd.f32 1.0, %v1767_v40 }
 0x643   : > { %v1771_v45 = vmul.f32 %v1769_v43, %v1719_v42 }
 0x645   : > { %v1772_v46 = vpack.c.bf16 %v1771_v45, %v1770_v44 }
 0x647   : > { %2823 = vmatmul.mubr.msk.bf16.vlgmr.msra.gmra.mxu1 %vm702_vm12, %v1772_v46  ;;  %v1780_v48 = vrot.slane %v1772_v46, 6  ;;  %v1783_v47 = vrot.slane %v1772_v46, 2 }
 0x648   : > { %2850 = vmatprep.mubr.msk.bf16.mxu1 %vm3351_vm4, %v3350_v0  ;;  %2835 = vmatpush3.bf16.msra.mxu1 %v3035_v16 }
 0x649   : > { %v1782_v50 = vsel %vm559_vm3, 0, %v1780_v48  ;;  %v1786_v52 = vsel %vm1784_vm11, %v1783_v47, 0  ;;  %2836 = vmatprep.subr.bf16.mxu1 %v3350_v0 }
 0x64a   : > { %2815 = vmatmul.mubr.msk.bf16.vlgmr.msra.gmra.mxu0 %vm702_vm12, %v1782_v50 }
 0x64b   : > { %2827 = vmatpush3.bf16.msra.mxu0 %v3032_v49  ;;  %2830 = vmatprep.mubr.msk.bf16.mxu0 %vm3351_vm4, %v3350_v0 }
 0x64c   : > { %2828 = vmatprep.subr.bf16.mxu0 %v3350_v0  ;;  %2837 = vmatpush3.bf16.msra.mxu1 %v3037_v55 }
 0x64d   : > { %2838 = vmatprep.subr.bf16.mxu1 %v3350_v0 }
 0x64f   : > { %2829 = vmatpush3.bf16.msra.mxu0 %v3033_v51 }
 0x650   : > { %2854 = vmatprep.subr.bf16.mxu0 %v3350_v0  ;;  %2839 = vmatpush3.bf16.msra.mxu1 %v3039_v27 }
 0x651   : > { %2840 = vmatprep.subr.bf16.mxu1 %v3350_v0 }
 0x652   : > { %2831 = vmatmul.mubr.msk.bf16.vlgmr.msra.gmra.mxu0 %vm702_vm12, %v1786_v52 }
 0x653   : > { %2870 = vmatprep.mubr.msk.bf16.mxu0 %vm3351_vm4, %v3350_v0  ;;  %2855 = vmatpush3.bf16.msra.mxu0 %v3034_v53 }
 0x654   : > { %2856 = vmatprep.subr.bf16.mxu0 %v3350_v0  ;;  %2841 = vmatpush3.bf16.msra.mxu1 %v3041_v58 }
 0x655   : > { %2842 = vmatprep.subr.bf16.mxu1 %v3350_v0 }
 0x657   : > { %2857 = vmatpush3.bf16.msra.mxu0 %v3036_v54 }
 0x658   : > { %2858 = vmatprep.subr.bf16.mxu0 %v3350_v0  ;;  %2843 = vmatpush3.bf16.msra.mxu1 %v3043_v60 }
 0x659   : > { %2844 = vmatprep.subr.bf16.mxu1 %v3350_v0 }
 0x65b   : > { %2859 = vmatpush3.bf16.msra.mxu0 %v3038_v56 }
 0x65c   : > { %2860 = vmatprep.subr.bf16.mxu0 %v3350_v0  ;;  %2845 = vmatpush3.bf16.msra.mxu1 %v3045_v61 }
 0x65d   : > { %2846 = vmatprep.subr.bf16.mxu1 %v3350_v0 }
 0x65f   : > { %2861 = vmatpush3.bf16.msra.mxu0 %v3040_v57 }
 0x660   : > { %2862 = vmatprep.subr.bf16.mxu0 %v3350_v0  ;;  %2847 = vmatpush3.bf16.msra.mxu1 %v3047_v62 }
 0x661   : > { %2848 = vmatprep.subr.bf16.mxu1 %v3350_v0 }
 0x663   : > { %2863 = vmatpush3.bf16.msra.mxu0 %v3042_v59 }
 0x664   : > { %2864 = vmatprep.subr.bf16.mxu0 %v3350_v0  ;;  %2849 = vmatpush3.bf16.msra.mxu1 %v3049_v1 }
 0x665   : > { %2874 = vmatprep.subr.bf16.mxu1 %v3350_v0 }
 0x667   : > { %2865 = vmatpush3.bf16.msra.mxu0 %v3044_v9 }
 0x668   : > { %2866 = vmatprep.subr.bf16.mxu0 %v3350_v0 }
 0x66b   : > { %2867 = vmatpush3.bf16.msra.mxu0 %v3046_v15 }
 0x66c   : > { %2868 = vmatprep.subr.bf16.mxu0 %v3350_v0 }
 0x66f   : > { %2869 = vmatpush3.bf16.msra.mxu0 %v3048_v63 }
 0x6d4   : > { %v3758_v2 = vpop.f32.mrf.mxu1 }
 0x6d6   : > { %v2808_v3 = vpop.f32.mrf.mxu1 }
 0x6d8   : > { %v3760_v4 = vpop.f32.mrf.mxu1 }
 0x6da   : > { %v2809_v5 = vpop.f32.mrf.mxu1 }
 0x707   : > { %v1895_v6 = vpop.f32.mrf.mxu1 }
 0x709   : > { %v2824_v7 = vpop.f32.mrf.mxu1 }
 0x70a   : > { %v1839_v8 = vpop.f32.mrf.mxu0 }
 0x70b   : > { %v1898_v10 = vpop.f32.mrf.mxu1  ;;  %v1896_v17 = vadd.f32 %v1895_v6, %v1839_v8 }
 0x70c   : > { %v2816_v11 = vpop.f32.mrf.mxu0 }
 0x70d   : > { %v2825_v12 = vpop.f32.mrf.mxu1 }
 0x70e   : > { %v1842_v13 = vpop.f32.mrf.mxu0 }
 0x70f   : > { %v1899_v23 = vadd.f32 %v1898_v10, %v1842_v13 }
 0x710   : > { %v2817_v14 = vpop.f32.mrf.mxu0 }
 0x712   : > { %v1955_v19 = vpop.f32.mrf.mxu0 }
 0x713   : > { %v1962_v21 = vadd.f32 %v1955_v19, %v1896_v17 }
 0x714   : > { %v2832_v22 = vpop.f32.mrf.mxu0 }
 0x715   : > { %v1970_v20 = vadd.f32 %v2587_v18, %v1962_v21  ;;  %v3051_v21 = vld [vmem:[#allocation10 + $0xb0] sm:$0xff]   ;;  %v3052_v22 = vld [vmem:[#allocation10 + $0xa8] sm:$0xff]  }
 0x716   : > { %v1958_v24 = vpop.f32.mrf.mxu0 }
 0x717   : > { %v1974_v25 = vmul.f32 0.70710677, %v1970_v20  ;;  %v1963_v28 = vadd.f32 %v1958_v24, %v1899_v23  ;;  %v1972_v10 = vmul.f32 0.5, %v1970_v20  ;;  %v3053_v23 = vld [vmem:[#allocation10 + $0xa0] sm:$0xff]   ;;  %v3054_v20 = vld [vmem:[#allocation10 + $0x98] sm:$0xff]   ;;  %v3055_v24 = vld [vmem:[#allocation10 + $0x90] sm:$0xff]  }
 0x718   : > { %v2833_v29 = vpop.f32.mrf.mxu0 }
 0x719   : > { %v1976_v30 = vand.u32 2147483647, %v1974_v25  ;;  %v1971_v31 = vadd.f32 %v2587_v18, %v1963_v28  ;;  %vm2016_vm12 = vcmp.lt.f32.partialorder %v1974_v25, 0.0  ;;  %v3050_v18 = vld [vmem:[#allocation10 + $0xb8] sm:$0xff]   ;;  %v3056_v25 = vld [vmem:[#allocation10 + $0x88] sm:$0xff]   ;;  %v3057_v28 = vld [vmem:[#allocation10 + $0x80] sm:$0xff]  }
 0x71b   : > { %v1978_v32 = vmul.f32 0.3275911, %v1976_v30  ;;  %v1975_v33 = vmul.f32 0.70710677, %v1971_v31  ;;  %v2004_v37 = vmul.f32 %v1976_v30, %v1976_v30  ;;  %v1973_v11 = vmul.f32 0.5, %v1971_v31 }
 0x71d   : > { %v1980_v26 = vadd.f32 1.0, %v1978_v32  ;;  %v1977_v34 = vand.u32 2147483647, %v1975_v33  ;;  %v2006_v38 = vsub.f32 0.0, %v2004_v37  ;;  %vm2017_vm13 = vcmp.lt.f32.partialorder %v1975_v33, 0.0 }
 0x71f   : > { %3098 = vrcp.f32 %v1980_v26  ;;  %v1979_v35 = vmul.f32 0.3275911, %v1977_v34  ;;  %v2005_v39 = vmul.f32 %v1977_v34, %v1977_v34  ;;  %v2008_v42 = vmul.f32 1.442695, %v2006_v38  ;;  %v2566_v38 = vld [vmem:[%s3845_s12] ss:$0 sm:$0xff] }
 0x721   : > { %v1981_v36 = vadd.f32 1.0, %v1979_v35  ;;  %v2007_v43 = vsub.f32 0.0, %v2005_v39 }
 0x723   : > { %3100 = vrcp.f32 %v1981_v36  ;;  %v2010_v49 = vmul.f32 1.442695, %v2007_v43 }
 0x724   : > { %3102 = vpow2.f32 %v2008_v42  ;;  %v1712_v42 = vadd.f32 %v2566_v38, %v3758_v2 }
 0x725   : > { %3104 = vpow2.f32 %v2010_v49 }
 0x72c   : > { %v3099_v40 = vpop.eup %3098 }
 0x72d   : > { %v1986_v41 = vmul.f32 1.0614054, %v3099_v40 }
 0x72f   : > { %v1988_v44 = vadd.f32 -1.4531521, %v1986_v41 }
 0x730   : > { %v3101_v45 = vpop.eup %3100 }
 0x731   : > { %v1990_v46 = vmul.f32 %v3099_v40, %v1988_v44  ;;  %v1987_v48 = vmul.f32 1.0614054, %v3101_v45  ;;  %v3103_v59 = vpop.eup %3102 }
 0x732   : > { %v3105_v62 = vpop.eup %3104 }
 0x733   : > { %v1992_v50 = vadd.f32 1.4214138, %v1990_v46  ;;  %v1989_v51 = vadd.f32 -1.4531521, %v1987_v48 }
 0x735   : > { %v1994_v47 = vmul.f32 %v3099_v40, %v1992_v50  ;;  %v1991_v52 = vmul.f32 %v3101_v45, %v1989_v51  ;;  %v1715_v50 = vadd.f32 %v2566_v38, %v3760_v4 }
 0x737   : > { %v1996_v53 = vadd.f32 -0.28449672, %v1994_v47  ;;  %v1993_v16 = vadd.f32 1.4214138, %v1991_v52 }
 0x739   : > { %v1998_v54 = vmul.f32 %v3099_v40, %v1996_v53  ;;  %v1995_v55 = vmul.f32 %v3101_v45, %v1993_v16 }
 0x73b   : > { %v2000_v56 = vadd.f32 0.2548296, %v1998_v54  ;;  %v1997_v27 = vadd.f32 -0.28449672, %v1995_v55 }
 0x73d   : > { %v2002_v57 = vmul.f32 %v3099_v40, %v2000_v56  ;;  %v1999_v58 = vmul.f32 %v3101_v45, %v1997_v27 }
 0x73f   : > { %v2012_v60 = vmul.f32 %v3103_v59, %v2002_v57  ;;  %v2001_v9 = vadd.f32 0.2548296, %v1999_v58 }
 0x741   : > { %v2014_v61 = vsub.f32 1.0, %v2012_v60  ;;  %v2003_v15 = vmul.f32 %v3101_v45, %v2001_v9 }
 0x743   : > { %v2018_v63 = vsub.f32 0.0, %v2014_v61  ;;  %v2013_v1 = vmul.f32 %v3105_v62, %v2003_v15 }
 0x745   : > { %v2020_v3 = vsel %vm2016_vm12, %v2018_v63, %v2014_v61  ;;  %v2015_v5 = vsub.f32 1.0, %v2013_v1 }
 0x746   : > { %v2022_v7 = vadd.f32 1.0, %v2020_v3 }
 0x747   : > { %v2019_v6 = vsub.f32 0.0, %v2015_v5 }
 0x748   : > { %v2024_v13 = vmul.f32 %v2022_v7, %v1972_v10 }
 0x749   : > { %v2021_v8 = vsel %vm2017_vm13, %v2019_v6, %v2015_v5 }
 0x74a   : > { %v2023_v12 = vadd.f32 1.0, %v2021_v8 }
 0x74c   : > { %v2025_v14 = vmul.f32 %v2023_v12, %v1973_v11 }
 0x74e   : > { %v2026_v17 = vpack.c.bf16 %v2025_v14, %v2024_v13 }
 0x750   : > { %2871 = vmatmul.mubr.bf16.vlgmr.msra.gmra.mxu0 %v2026_v17  ;;  %v2046_v19 = vrot.slane %v2026_v17, 6  ;;  %v2050_v29 = vrot.slane %v2026_v17, 2 }
 0x752   : > { %2851 = vmatmul.mubr.msk.bf16.vlgmr.msra.gmra.mxu1 %vm2596_vm14, %v2046_v19 }
 0x753   : > { %2875 = vmatpush3.bf16.msra.mxu1 %v3050_v18  ;;  %2890 = vmatprep.mubr.msk.bf16.mxu1 %vm3351_vm4, %v3350_v0 }
 0x754   : > { %2876 = vmatprep.subr.bf16.mxu1 %v3350_v0 }
 0x757   : > { %2877 = vmatpush3.bf16.msra.mxu1 %v3051_v21 }
 0x758   : > { %2878 = vmatprep.subr.bf16.mxu1 %v3350_v0 }
 0x75b   : > { %2879 = vmatpush3.bf16.msra.mxu1 %v3052_v22 }
 0x75c   : > { %2880 = vmatprep.subr.bf16.mxu1 %v3350_v0 }
 0x75f   : > { %2881 = vmatpush3.bf16.msra.mxu1 %v3053_v23 }
 0x760   : > { %2882 = vmatprep.subr.bf16.mxu1 %v3350_v0 }
 0x763   : > { %2883 = vmatpush3.bf16.msra.mxu1 %v3054_v20 }
 0x764   : > { %2884 = vmatprep.subr.bf16.mxu1 %v3350_v0 }
 0x767   : > { %2885 = vmatpush3.bf16.msra.mxu1 %v3055_v24 }
 0x768   : > { %2886 = vmatprep.subr.bf16.mxu1 %v3350_v0 }
 0x76b   : > { %2887 = vmatpush3.bf16.msra.mxu1 %v3056_v25 }
 0x76c   : > { %2888 = vmatprep.subr.bf16.mxu1 %v3350_v0  ;;  %v2615_v0 = vld [vmem:[%s3843_s10] ss:$0 sm:$0xff] }
 0x76f   : > { %2889 = vmatpush3.bf16.msra.mxu1 %v3057_v28 }
 0x772   : > { %2891 = vmatmul.mubr.msk.bf16.vlgmr.msra.gmra.mxu1 %vm1784_vm11, %v2050_v29 }
 0x810   : > { %v2241_v30 = vpop.f32.mrf.mxu0 }
 0x812   : > { %v2152_v31 = vpop.f32.mrf.mxu1  ;;  %v2872_v32 = vpop.f32.mrf.mxu0 }
 0x813   : > { %v2242_v37 = vadd.f32 %v2241_v30, %v2152_v31 }
 0x814   : > { %v2852_v33 = vpop.f32.mrf.mxu1  ;;  %v2244_v26 = vpop.f32.mrf.mxu0 }
 0x816   : > { %v2155_v34 = vpop.f32.mrf.mxu1  ;;  %v2873_v35 = vpop.f32.mrf.mxu0 }
 0x817   : > { %v2245_v43 = vadd.f32 %v2244_v26, %v2155_v34 }
 0x818   : > { %v2853_v36 = vpop.f32.mrf.mxu1 }
 0x832   : > { %v2347_v39 = vpop.f32.mrf.mxu1 }
 0x833   : > { %v2354_v40 = vadd.f32 %v2347_v39, %v2242_v37 }
 0x834   : > { %v2892_v41 = vpop.f32.mrf.mxu1 }
 0x835   : > { %v2362_v44 = vadd.f32 %v2615_v0, %v2354_v40 }
 0x836   : > { %v2350_v45 = vpop.f32.mrf.mxu1 }
 0x837   : > { %v2364_v46 = vadd.f32 %v2362_v44, %v1712_v42  ;;  %v2355_v48 = vadd.f32 %v2350_v45, %v2245_v43 }
 0x838   : > { %v2893_v49 = vpop.f32.mrf.mxu1 }
 0x839   : > { %2366 = vst [vmem:[%s519_s30] sm:$0xff] %v2364_v46  ;;  %v2363_v51 = vadd.f32 %v2615_v0, %v2355_v48 }
 0x83b   : > { %v2365_v2 = vadd.f32 %v2363_v51, %v1715_v50 }
 0x83d   : > { %2367 = vst [vmem:[%s519_s30 + $0x8] sm:$0xff] %v2365_v2 }
 0x83e   : > { %3275 = shalt.err (!%p3272_p0)
}
 0x83f   : > { %s3276_s16 = scalar_lea.hbm %s3791_s28, 256  ;;  %s3280_s15 = scalar_lea.hbm %s3846_s13, 512 }
 0x840   : > { %p3277_p1 = scmp.ne.s32.totalorder %s3791_s28, %s3276_s16  ;;  %p3281_p2 = scmp.lt.s32.totalorder %s3791_s28, %s3846_s13 }
 0x841   : > { %p3282_p4 = scmp.lt.s32.totalorder %s3280_s15, %s3276_s16 }
 0x842   : > { %p3278_p3 = pnand %p3277_p1, %p3886_p11 }
 0x843   : > { %p3283_p7 = por %p3282_p4, %p3281_p2 }
 0x844   : > { %p3279_p12 = pneg %p3278_p3 }
 0x846   : > { %p3284_p8 = pnand %p3283_p7, %p3279_p12 }
 0x848   : > { %3287 = shalt.err (!%p3284_p8)
}
 0x849   : > { %s3353_s14 = smov 128   ;;  %s3354_s25 = smov 8  }
 0x84a   : > { %2918 = dma.vmem_to_hbm [thread:$0]  (%p3886_p11), %s3786_s24, 256, %s3791_s28, %s3793_s21, %s3353_s14, %s3353_s14, %s3354_s25  }
 0x84b PF: > { %s3887_s29 = sld [smem:[#allocation21_spill]] }
 0x84c   : > { %s3888_s19 = sld [smem:[#allocation19_spill]] }
 0x84d   : > { %s3889_s27 = sld [smem:[#allocation24_spill]] }
 0x851   : > { %p2955_p9 = scmp.ge.s32.totalorder %s3887_s29, 2 }
 0x852   : > { %s2397_s17 = sand.u32 1, %s3888_s19  }
 0x853   : > { %p3890_p5 = scmp.ne.s32.totalorder %s3889_s27, 0  ;;  %s2398_s16 = scalar_lea.sflag [#allocation4], %s2397_s17 }
 0x855   : > { %p2940_p6 = pnand %p2955_p9, %p3890_p5 }
 0x857   : > { %p2941_p13 = pneg %p2940_p6 }
 0x859   : > { %3321 = dma.done.wait (%p2941_p13), %s2398_s16, 256  }
 0x85a   : > { %3323 = vsyncadd (%p2941_p13), %s2398_s16, 4294967040  ;;  %s3891_s28 = sld [smem:[#allocation22_spill]]  ;;  %s3894_s25 = smov %s3330_s26 }
 0x85b   : > { %s3892_s20 = sld [smem:[#allocation20_spill]] }
 0x85c   : > { %s3893_s27 = sld [smem:[#allocation23_spill]] }
 0x860   : > { %p27_p10 = scmp.ge.s32.totalorder %s3891_s28, 4  }
 0x861   : > { %s3895_s26 = smov %s3892_s20 }
 0x862   :  { %29 = sbr.rel (!%p27_p10) target bundleno = 7 (0x7), region = 148 }
 0x867   :  { %2403 = vsyncpa [#allocation3], 1 }
 0x868   :  { %2405 = vsyncpa [#allocation3 + $0x1], 1 }
 0x869   :  { %2406 = vsyncpa [#allocation6], 1 }
 0x86a   :  { %2407 = vsyncpa [#allocation9], 1 }
 0x86b   :  { %2408 = vsyncpa [#allocation12], 1 }
 0x86c   :  { %2409 = vsyncpa [#allocation4], 1 }
 0x86d   :  { %2411 = vsyncpa [#allocation4 + $0x1], 1 }

</bundles_post_ra>
